<compile_context>
chip_gen: v5e
topology: v5e:2x2
jax: 0.10.0
libtpu: 0.0.40
codegen_flags: <defaults>
</compile_context>

<pallas_src>
import functools

import jax
import jax.numpy as jnp
from jax.experimental import pallas as pl
from jax.experimental.pallas import tpu as pltpu


# ----------------------------------------------------------------------------
# small helpers
# ----------------------------------------------------------------------------
def _round_up(x, m):
    return (x + m - 1) // m * m


def _ceil_div(a, b):
    return -(-a // b)


def _vmem_limit(est_bytes):
    # stay well below v7x's 64 MiB physical VMEM; default scoped is 16-32 MiB
    return int(min(50 * 2**20, max(32 * 2**20, 2 * est_bytes)))


# ----------------------------------------------------------------------------
# Pallas kernel 1: fused 3x3 stride-1 conv (9-tap accumulation) + bias + ReLU
# ----------------------------------------------------------------------------
def _conv3x3_s1_kernel(x_ref, w_ref, b_ref, o_ref, acc_ref, *, wp, m):
    # x_ref: (1, Hp*Wp, Cin) bf16   w_ref: (9, Cin, Cp) bf16 (BN scale folded)
    # b_ref: (1, Cp) f32            o_ref: (1, M, Cp) bf16   acc_ref: (M, Cp) f32
    for t in range(9):
        dy, dx = divmod(t, 3)
        off = dy * wp + dx                          # static flat-row offset
        part = jnp.dot(x_ref[0, pl.ds(off, m), :], w_ref[t],
                       preferred_element_type=jnp.float32)
        if t == 0:
            acc_ref[...] = part
        else:
            acc_ref[...] += part
    y = jnp.maximum(acc_ref[...] + b_ref[...], 0.0)   # folded BN bias + ReLU (f32)
    o_ref[0] = y.astype(o_ref.dtype)


# ----------------------------------------------------------------------------
# Pallas kernel 2: generic fused (X @ W) + bias -> ReLU
# ----------------------------------------------------------------------------
def _matmul_bias_relu_kernel(x_ref, w_ref, b_ref, o_ref):
    acc = jnp.dot(x_ref[...], w_ref[...], preferred_element_type=jnp.float32)
    o_ref[...] = jnp.maximum(acc + b_ref[...], 0.0).astype(o_ref.dtype)


def _pick_tm(M, K, Np):
    """Fixed, sublane-aligned row tile; >=2 grid steps when possible; VMEM-aware."""
    tm = 512
    if M < 2 * tm:
        tm = max(8, _round_up(_ceil_div(M, 2), 8))

    def est(t):  # double-buffered x/out tiles + resident weight + f32 epilogue
        return 2 * t * K * 2 + K * Np * 2 + 2 * t * Np * 2 + t * Np * 4

    while tm > 64 and est(tm) > 16 * 2**20:
        tm = max(64, tm // 2)
    return tm


def _matmul_bias_relu(x2d, w, bias):
    """relu(x2d @ w + bias); x2d/w bf16, bias f32 (1, Np); returns bf16 (M, Np)."""
    M, K = x2d.shape
    Kw, Np = w.shape
    assert K == Kw and Np % 128 == 0
    tm = _pick_tm(M, K, Np)
    Mp = _round_up(M, tm)
    if Mp != M:
        x2d = jnp.pad(x2d, ((0, Mp - M), (0, 0)))     # pad rows, never tm < 8
    est = 2 * tm * K * 2 + K * Np * 2 + 2 * tm * Np * 2 + tm * Np * 4
    y = pl.pallas_call(
        _matmul_bias_relu_kernel,
        out_shape=jax.ShapeDtypeStruct((Mp, Np), x2d.dtype),
        grid=(Mp // tm,),
        in_specs=[
            pl.BlockSpec((tm, K), lambda i: (i, 0)),
            pl.BlockSpec((K, Np), lambda i: (0, 0)),
            pl.BlockSpec((1, Np), lambda i: (0, 0)),
        ],
        out_specs=pl.BlockSpec((tm, Np), lambda i: (i, 0)),
        compiler_params=pltpu.CompilerParams(
            dimension_semantics=("parallel",),
            vmem_limit_bytes=_vmem_limit(est)),
    )(x2d, w, bias)
    return y[:M] if Mp != M else y


# ----------------------------------------------------------------------------
# conv / deconv layer wrappers
# ----------------------------------------------------------------------------
_FUSED_CONV_VMEM_BUDGET = 20 * 2**20


def _conv3x3_fused_est(H, W, C, Cp):
    L = (H + 3) * (W + 2)
    M = H * (W + 2)
    return 2 * L * C * 2 + 9 * C * Cp * 2 + 2 * M * Cp * 2 + M * Cp * 4


def _conv3x3_s1_fused(x, w, bias, cout):
    """stride-1 ZeroPad2d(1)+Conv2d(3x3)+BN+ReLU, 9-tap accumulation in-kernel."""
    N, H, W, C = x.shape
    Cp = w.shape[-1]
    Wp = W + 2
    L = (H + 3) * Wp                                  # extra bottom row keeps taps in-bounds
    M = H * Wp                                        # flat output rows (Wp-wide, cols >=W garbage)
    xp = jnp.pad(x, ((0, 0), (1, 2), (1, 1), (0, 0))).reshape(N, L, C)
    w9 = w.reshape(9, C, Cp)
    est = _conv3x3_fused_est(H, W, C, Cp)
    kernel = functools.partial(_conv3x3_s1_kernel, wp=Wp, m=M)
    y = pl.pallas_call(
        kernel,
        out_shape=jax.ShapeDtypeStruct((N, M, Cp), x.dtype),
        grid=(N,),                                    # batch axis -> both v7x TensorCores
        in_specs=[
            pl.BlockSpec((1, L, C), lambda n: (n, 0, 0)),
            pl.BlockSpec((9, C, Cp), lambda n: (0, 0, 0)),
            pl.BlockSpec((1, Cp), lambda n: (0, 0)),
        ],
        out_specs=pl.BlockSpec((1, M, Cp), lambda n: (n, 0, 0)),
        scratch_shapes=[pltpu.VMEM((M, Cp), jnp.float32)],
        compiler_params=pltpu.CompilerParams(
            dimension_semantics=("parallel",),
            vmem_limit_bytes=_vmem_limit(est)),
    )(xp, w9, bias)
    # drop the Wp->W cross-row garbage columns and the lane padding of Cout
    return y.reshape(N, H, Wp, Cp)[:, :, :W, :cout]


def _conv3x3_im2col(x, w, bias, cout, stride):
    """Strided (or VMEM-too-large) 3x3 conv: stride-FIRST im2col + matmul kernel."""
    N, H, W, C = x.shape
    Cp = w.shape[-1]
    xp = jnp.pad(x, ((0, 0), (1, 1), (1, 1), (0, 0)))
    Ho = (H - 1) // stride + 1
    Wo = (W - 1) // stride + 1
    taps = [xp[:, dy:dy + stride * (Ho - 1) + 1:stride,
               dx:dx + stride * (Wo - 1) + 1:stride, :]
            for dy in range(3) for dx in range(3)]
    cols = jnp.concatenate(taps, axis=-1).reshape(N * Ho * Wo, 9 * C)
    y = _matmul_bias_relu(cols, w.reshape(9 * C, Cp), bias)
    return y[:, :cout].reshape(N, Ho, Wo, cout)


def conv3x3_bn_relu(x, layer):
    w, bias, cout, stride = layer['w'], layer['b'], layer['cout'], layer['stride']
    if stride == 1:
        _, H, W, C = x.shape
        if _conv3x3_fused_est(H, W, C, w.shape[-1]) <= _FUSED_CONV_VMEM_BUDGET:
            return _conv3x3_s1_fused(x, w, bias, cout)
    return _conv3x3_im2col(x, w, bias, cout, stride)


def deconv_bn_relu(x, db):
    """ConvTranspose2d(kernel=stride=k)+BN+ReLU as a 1x1 matmul + pixel shuffle."""
    N, H, W, Cin = x.shape
    k, cout, ncols = db['k'], db['cout'], db['ncols']
    y = _matmul_bias_relu(x.reshape(N * H * W, Cin), db['w'], db['b'])[:, :ncols]
    if k == 1:
        return y.reshape(N, H, W, cout)
    # TODO(synk): fold the pixel-shuffle transpose into an output index_map.
    y = y.reshape(N, H, W, cout, k, k).transpose(0, 1, 4, 2, 5, 3)
    return y.reshape(N, H * k, W * k, cout)


def convkxk_stride_bn_relu(x, db):
    """Conv2d(kernel=stride=k, padding=0)+BN+ReLU (downsample deblock)."""
    N, H, W, Cin = x.shape
    k, cout = db['k'], db['cout']
    Ho, Wo = H // k, W // k
    xs = x.reshape(N, Ho, k, Wo, k, Cin).transpose(0, 1, 3, 2, 4, 5)
    cols = xs.reshape(N * Ho * Wo, k * k * Cin)
    y = _matmul_bias_relu(cols, db['w'], db['b'])
    return y[:, :cout].reshape(N, Ho, Wo, cout)


# ----------------------------------------------------------------------------
# Deterministic parameter construction (mirrors BaseBEVBackbone.__init__).
# BN is folded in eval mode (running stats); scale folded into the weights in
# f32 BEFORE the bf16 cast; weight columns zero-padded to a multiple of 128.
# ----------------------------------------------------------------------------
def fold_bn(gamma, beta, mean, var, eps=1e-3):
    scale = gamma / jnp.sqrt(var + eps)
    bias = beta - mean * scale
    return scale, bias


def init_bn(key, c):
    k1, k2, k3, k4 = jax.random.split(key, 4)
    gamma = 1.0 + 0.1 * jax.random.normal(k1, (c,), jnp.float32)
    beta = 0.05 * jax.random.normal(k2, (c,), jnp.float32)
    mean = 0.1 * jax.random.normal(k3, (c,), jnp.float32)
    var = 0.5 + jax.random.uniform(k4, (c,), jnp.float32)
    return fold_bn(gamma, beta, mean, var)


def _make_conv_layer(kw, kb, cin, cout, stride):
    w = 0.1 * jax.random.normal(kw, (3, 3, cin, cout), jnp.float32)
    scale, bias = init_bn(kb, cout)
    cp = _round_up(cout, 128)                         # lane-dense matmul N dim
    wf = jnp.pad(w * scale[None, None, None, :], ((0, 0),) * 3 + ((0, cp - cout),))
    b = jnp.pad(bias, (0, cp - cout)).reshape(1, cp).astype(jnp.float32)
    return dict(w=wf.astype(jnp.bfloat16), b=b, stride=stride, cout=cout)


def _make_deconv(kw, kb, cin, cout, k):
    w = 0.1 * jax.random.normal(kw, (cin, cout, k, k), jnp.float32)
    scale, bias = init_bn(kb, cout)
    ncols = cout * k * k
    npad = _round_up(ncols, 128)
    w2 = w.reshape(cin, ncols) * jnp.repeat(scale, k * k)[None, :]
    w2 = jnp.pad(w2, ((0, 0), (0, npad - ncols)))
    b2 = jnp.pad(jnp.repeat(bias, k * k), (0, npad - ncols)).reshape(1, npad)
    return dict(kind='deconv', w=w2.astype(jnp.bfloat16), b=b2.astype(jnp.float32),
                k=k, cout=cout, ncols=ncols)


def _make_down_deblock(kw, kb, cin, cout, k):
    w = 0.1 * jax.random.normal(kw, (k, k, cin, cout), jnp.float32)
    scale, bias = init_bn(kb, cout)
    cp = _round_up(cout, 128)
    wf = jnp.pad((w * scale[None, None, None, :]).reshape(k * k * cin, cout),
                 ((0, 0), (0, cp - cout)))
    b = jnp.pad(bias, (0, cp - cout)).reshape(1, cp).astype(jnp.float32)
    return dict(kind='conv', w=wf.astype(jnp.bfloat16), b=b, k=k, cout=cout)


def init_base_bev_backbone(key, model_cfg, input_channels):
    layer_nums = model_cfg.get('layer_nums', [])
    layer_strides = model_cfg.get('layer_strides', [])
    num_filters = model_cfg.get('num_filters', [])
    upsample_strides = model_cfg.get('upsample_strides', [])
    num_upsample_filters = model_cfg.get('num_upsample_filter', [])
    num_levels = len(layer_nums)
    c_in_list = [input_channels, *num_filters[:-1]]

    blocks, deblocks = [], []
    for idx in range(num_levels):
        layers = []
        cin, cout = c_in_list[idx], num_filters[idx]
        key, kw, kb = jax.random.split(key, 3)
        layers.append(_make_conv_layer(kw, kb, cin, cout, layer_strides[idx]))
        for _ in range(layer_nums[idx]):
            key, kw, kb = jax.random.split(key, 3)
            layers.append(_make_conv_layer(kw, kb, cout, cout, 1))
        blocks.append(layers)

        if len(upsample_strides) > 0:
            s = upsample_strides[idx]
            uf = num_upsample_filters[idx]
            key, kw, kb = jax.random.split(key, 3)
            if s >= 1:
                deblocks.append(_make_deconv(kw, kb, cout, uf, int(s)))
            else:
                deblocks.append(_make_down_deblock(kw, kb, cout, uf, int(round(1.0 / s))))

    c_in = sum(num_upsample_filters)
    if len(upsample_strides) > num_levels:
        key, kw, kb = jax.random.split(key, 3)
        deblocks.append(_make_deconv(kw, kb, c_in, c_in, int(upsample_strides[-1])))
    return dict(blocks=blocks, deblocks=deblocks, num_bev_features=c_in)


# ----------------------------------------------------------------------------
# Forward pass (mirrors BaseBEVBackbone.forward)
# ----------------------------------------------------------------------------
def base_bev_backbone_forward(params, data_dict):
    spatial_features = data_dict['spatial_features']            # NCHW f32 (PyTorch)
    x = jnp.transpose(spatial_features, (0, 2, 3, 1)).astype(jnp.bfloat16)  # NHWC bf16
    ups = []
    ret = dict(data_dict)
    H_in = spatial_features.shape[2]

    for i, layers in enumerate(params['blocks']):
        for layer in layers:
            x = conv3x3_bn_relu(x, layer)
        stride = int(H_in // x.shape[1])
        ret['spatial_features_%dx' % stride] = jnp.transpose(
            x.astype(jnp.float32), (0, 3, 1, 2))                 # NCHW at the boundary
        if len(params['deblocks']) > 0:
            db = params['deblocks'][i]
            if db['kind'] == 'deconv':
                ups.append(deconv_bn_relu(x, db))
            else:
                ups.append(convkxk_stride_bn_relu(x, db))
        else:
            ups.append(x)

    if len(ups) > 1:
        x = jnp.concatenate(ups, axis=-1)                        # channel concat (dim=1 NCHW)
    elif len(ups) == 1:
        x = ups[0]

    if len(params['deblocks']) > len(params['blocks']):
        x = deconv_bn_relu(x, params['deblocks'][-1])

    ret['spatial_features_2d'] = jnp.transpose(x.astype(jnp.float32), (0, 3, 1, 2))
    return ret


# ----------------------------------------------------------------------------
if __name__ == "__main__":
    # Small config consistent with the module (2 levels, downsample + upsample);
    # exercises both the fused stride-1 conv kernel and the im2col/matmul kernel.
    cfg = {
        'layer_nums': [1, 1],
        'layer_strides': [1, 2],
        'num_filters': [8, 16],
        'upsample_strides': [1, 2],
        'num_upsample_filter': [8, 8],
    }
    key = jax.random.PRNGKey(0)
    kp, kx = jax.random.split(key)
    params = init_base_bev_backbone(kp, cfg, input_channels=4)

    x = jax.random.normal(kx, (2, 4, 16, 16), jnp.float32)       # NCHW, like PyTorch
    out = base_bev_backbone_forward(params, {'spatial_features': x})
    y = jax.block_until_ready(out['spatial_features_2d'])

    # sum(num_upsample_filter)=16 channels at full 16x16 resolution, NCHW, f32
    assert y.shape == (2, 16, 16, 16), y.shape
    assert y.dtype == jnp.float32
    assert bool(jnp.all(jnp.isfinite(y)))
    assert bool(jnp.all(y >= 0.0))            # ReLU epilogue
    # TODO(synk): training-mode BatchNorm (batch statistics + running-stat momentum
    # update) is not reproduced; BN is folded in eval mode with synthetic running stats.
    print("KERNEL_OK")
</pallas_src>

<mosaic_0001>
module attributes {stable_mosaic.version = 11 : i64} {
  func.func @_conv3x3_s1_kernel(%arg0: i32, %arg1: memref<1x342x4xbf16, #tpu.memory_space<vmem>>, %arg2: memref<9x4x128xbf16, #tpu.memory_space<vmem>>, %arg3: memref<1x128xf32, #tpu.memory_space<vmem>>, %arg4: memref<1x288x128xbf16, #tpu.memory_space<vmem>>, %arg5: memref<288x128xf32, #tpu.memory_space<vmem>>) attributes {dimension_semantics = [#tpu.dimension_semantics<parallel>], iteration_bounds = array<i64: 2>, scalar_prefetch = 0 : i64, scratch_operands = 1 : i64, tpu.core_type = #tpu.core_type<tc>, window_params = [{transform_indices = @transform_0, window_bounds = array<i64: 1, 342, 4>}, {pipeline_mode = #tpu.pipeline_mode<synchronous>, transform_indices = @transform_1, window_bounds = array<i64: 9, 4, 128>}, {pipeline_mode = #tpu.pipeline_mode<synchronous>, transform_indices = @transform_2, window_bounds = array<i64: 1, 128>}, {transform_indices = @transform_3, window_bounds = array<i64: 1, 288, 128>}]} {
    %c0 = arith.constant 0 : index
    %c0_0 = arith.constant 0 : index
    %c0_1 = arith.constant 0 : index
    %0 = vector.load %arg1[%c0, %c0_0, %c0_1] : memref<1x342x4xbf16, #tpu.memory_space<vmem>>, vector<1x288x4xbf16>
    %1 = vector.shape_cast %0 : vector<1x288x4xbf16> to vector<288x4xbf16>
    %c0_2 = arith.constant 0 : index
    %c0_3 = arith.constant 0 : index
    %c0_4 = arith.constant 0 : index
    %2 = vector.load %arg2[%c0_2, %c0_3, %c0_4] : memref<9x4x128xbf16, #tpu.memory_space<vmem>>, vector<1x4x128xbf16>
    %3 = vector.shape_cast %2 : vector<1x4x128xbf16> to vector<4x128xbf16>
    %cst = arith.constant dense<0.000000e+00> : vector<288x128xf32>
    %4 = tpu.matmul %1, %3, %cst {dimension_numbers = #tpu.dot_dimension_numbers<[1], [0], [0], [1], [0, 0, 1, 1], [], []>} : vector<288x4xbf16>, vector<4x128xbf16>, vector<288x128xf32> -> vector<288x128xf32>
    %c0_5 = arith.constant 0 : index
    %c0_6 = arith.constant 0 : index
    %5 = vector.load %arg5[%c0_5, %c0_6] : memref<288x128xf32, #tpu.memory_space<vmem>>, vector<288x128xf32>
    tpu.vector_store %arg5[%c0_5, %c0_6], %4 {strides = array<i32>} : memref<288x128xf32, #tpu.memory_space<vmem>>, vector<288x128xf32>,
    %c0_7 = arith.constant 0 : index
    %c1 = arith.constant 1 : index
    %c0_8 = arith.constant 0 : index
    %6 = vector.load %arg1[%c0_7, %c1, %c0_8] : memref<1x342x4xbf16, #tpu.memory_space<vmem>>, vector<1x288x4xbf16>
    %7 = vector.shape_cast %6 : vector<1x288x4xbf16> to vector<288x4xbf16>
    %c1_9 = arith.constant 1 : index
    %c0_10 = arith.constant 0 : index
    %c0_11 = arith.constant 0 : index
    %8 = vector.load %arg2[%c1_9, %c0_10, %c0_11] : memref<9x4x128xbf16, #tpu.memory_space<vmem>>, vector<1x4x128xbf16>
    %9 = vector.shape_cast %8 : vector<1x4x128xbf16> to vector<4x128xbf16>
    %cst_12 = arith.constant dense<0.000000e+00> : vector<288x128xf32>
    %10 = tpu.matmul %7, %9, %cst_12 {dimension_numbers = #tpu.dot_dimension_numbers<[1], [0], [0], [1], [0, 0, 1, 1], [], []>} : vector<288x4xbf16>, vector<4x128xbf16>, vector<288x128xf32> -> vector<288x128xf32>
    %c0_13 = arith.constant 0 : index
    %c0_14 = arith.constant 0 : index
    %11 = vector.load %arg5[%c0_13, %c0_14] : memref<288x128xf32, #tpu.memory_space<vmem>>, vector<288x128xf32>
    %12 = arith.addf %11, %10 : vector<288x128xf32>
    %c0_15 = arith.constant 0 : index
    %c0_16 = arith.constant 0 : index
    %13 = vector.load %arg5[%c0_15, %c0_16] : memref<288x128xf32, #tpu.memory_space<vmem>>, vector<288x128xf32>
    tpu.vector_store %arg5[%c0_15, %c0_16], %12 {strides = array<i32>} : memref<288x128xf32, #tpu.memory_space<vmem>>, vector<288x128xf32>,
    %c0_17 = arith.constant 0 : index
    %c2 = arith.constant 2 : index
    %c0_18 = arith.constant 0 : index
    %14 = vector.load %arg1[%c0_17, %c2, %c0_18] : memref<1x342x4xbf16, #tpu.memory_space<vmem>>, vector<1x288x4xbf16>
    %15 = vector.shape_cast %14 : vector<1x288x4xbf16> to vector<288x4xbf16>
    %c2_19 = arith.constant 2 : index
    %c0_20 = arith.constant 0 : index
    %c0_21 = arith.constant 0 : index
    %16 = vector.load %arg2[%c2_19, %c0_20, %c0_21] : memref<9x4x128xbf16, #tpu.memory_space<vmem>>, vector<1x4x128xbf16>
    %17 = vector.shape_cast %16 : vector<1x4x128xbf16> to vector<4x128xbf16>
    %cst_22 = arith.constant dense<0.000000e+00> : vector<288x128xf32>
    %18 = tpu.matmul %15, %17, %cst_22 {dimension_numbers = #tpu.dot_dimension_numbers<[1], [0], [0], [1], [0, 0, 1, 1], [], []>} : vector<288x4xbf16>, vector<4x128xbf16>, vector<288x128xf32> -> vector<288x128xf32>
    %c0_23 = arith.constant 0 : index
    %c0_24 = arith.constant 0 : index
    %19 = vector.load %arg5[%c0_23, %c0_24] : memref<288x128xf32, #tpu.memory_space<vmem>>, vector<288x128xf32>
    %20 = arith.addf %19, %18 : vector<288x128xf32>
    %c0_25 = arith.constant 0 : index
    %c0_26 = arith.constant 0 : index
    %21 = vector.load %arg5[%c0_25, %c0_26] : memref<288x128xf32, #tpu.memory_space<vmem>>, vector<288x128xf32>
    tpu.vector_store %arg5[%c0_25, %c0_26], %20 {strides = array<i32>} : memref<288x128xf32, #tpu.memory_space<vmem>>, vector<288x128xf32>,
    %c0_27 = arith.constant 0 : index
    %c18 = arith.constant 18 : index
    %c0_28 = arith.constant 0 : index
    %22 = vector.load %arg1[%c0_27, %c18, %c0_28] : memref<1x342x4xbf16, #tpu.memory_space<vmem>>, vector<1x288x4xbf16>
    %23 = vector.shape_cast %22 : vector<1x288x4xbf16> to vector<288x4xbf16>
    %c3 = arith.constant 3 : index
    %c0_29 = arith.constant 0 : index
    %c0_30 = arith.constant 0 : index
    %24 = vector.load %arg2[%c3, %c0_29, %c0_30] : memref<9x4x128xbf16, #tpu.memory_space<vmem>>, vector<1x4x128xbf16>
    %25 = vector.shape_cast %24 : vector<1x4x128xbf16> to vector<4x128xbf16>
    %cst_31 = arith.constant dense<0.000000e+00> : vector<288x128xf32>
    %26 = tpu.matmul %23, %25, %cst_31 {dimension_numbers = #tpu.dot_dimension_numbers<[1], [0], [0], [1], [0, 0, 1, 1], [], []>} : vector<288x4xbf16>, vector<4x128xbf16>, vector<288x128xf32> -> vector<288x128xf32>
    %c0_32 = arith.constant 0 : index
    %c0_33 = arith.constant 0 : index
    %27 = vector.load %arg5[%c0_32, %c0_33] : memref<288x128xf32, #tpu.memory_space<vmem>>, vector<288x128xf32>
    %28 = arith.addf %27, %26 : vector<288x128xf32>
    %c0_34 = arith.constant 0 : index
    %c0_35 = arith.constant 0 : index
    %29 = vector.load %arg5[%c0_34, %c0_35] : memref<288x128xf32, #tpu.memory_space<vmem>>, vector<288x128xf32>
    tpu.vector_store %arg5[%c0_34, %c0_35], %28 {strides = array<i32>} : memref<288x128xf32, #tpu.memory_space<vmem>>, vector<288x128xf32>,
    %c0_36 = arith.constant 0 : index
    %c19 = arith.constant 19 : index
    %c0_37 = arith.constant 0 : index
    %30 = vector.load %arg1[%c0_36, %c19, %c0_37] : memref<1x342x4xbf16, #tpu.memory_space<vmem>>, vector<1x288x4xbf16>
    %31 = vector.shape_cast %30 : vector<1x288x4xbf16> to vector<288x4xbf16>
    %c4 = arith.constant 4 : index
    %c0_38 = arith.constant 0 : index
    %c0_39 = arith.constant 0 : index
    %32 = vector.load %arg2[%c4, %c0_38, %c0_39] : memref<9x4x128xbf16, #tpu.memory_space<vmem>>, vector<1x4x128xbf16>
    %33 = vector.shape_cast %32 : vector<1x4x128xbf16> to vector<4x128xbf16>
    %cst_40 = arith.constant dense<0.000000e+00> : vector<288x128xf32>
    %34 = tpu.matmul %31, %33, %cst_40 {dimension_numbers = #tpu.dot_dimension_numbers<[1], [0], [0], [1], [0, 0, 1, 1], [], []>} : vector<288x4xbf16>, vector<4x128xbf16>, vector<288x128xf32> -> vector<288x128xf32>
    %c0_41 = arith.constant 0 : index
    %c0_42 = arith.constant 0 : index
    %35 = vector.load %arg5[%c0_41, %c0_42] : memref<288x128xf32, #tpu.memory_space<vmem>>, vector<288x128xf32>
    %36 = arith.addf %35, %34 : vector<288x128xf32>
    %c0_43 = arith.constant 0 : index
    %c0_44 = arith.constant 0 : index
    %37 = vector.load %arg5[%c0_43, %c0_44] : memref<288x128xf32, #tpu.memory_space<vmem>>, vector<288x128xf32>
    tpu.vector_store %arg5[%c0_43, %c0_44], %36 {strides = array<i32>} : memref<288x128xf32, #tpu.memory_space<vmem>>, vector<288x128xf32>,
    %c0_45 = arith.constant 0 : index
    %c20 = arith.constant 20 : index
    %c0_46 = arith.constant 0 : index
    %38 = vector.load %arg1[%c0_45, %c20, %c0_46] : memref<1x342x4xbf16, #tpu.memory_space<vmem>>, vector<1x288x4xbf16>
    %39 = vector.shape_cast %38 : vector<1x288x4xbf16> to vector<288x4xbf16>
    %c5 = arith.constant 5 : index
    %c0_47 = arith.constant 0 : index
    %c0_48 = arith.constant 0 : index
    %40 = vector.load %arg2[%c5, %c0_47, %c0_48] : memref<9x4x128xbf16, #tpu.memory_space<vmem>>, vector<1x4x128xbf16>
    %41 = vector.shape_cast %40 : vector<1x4x128xbf16> to vector<4x128xbf16>
    %cst_49 = arith.constant dense<0.000000e+00> : vector<288x128xf32>
    %42 = tpu.matmul %39, %41, %cst_49 {dimension_numbers = #tpu.dot_dimension_numbers<[1], [0], [0], [1], [0, 0, 1, 1], [], []>} : vector<288x4xbf16>, vector<4x128xbf16>, vector<288x128xf32> -> vector<288x128xf32>
    %c0_50 = arith.constant 0 : index
    %c0_51 = arith.constant 0 : index
    %43 = vector.load %arg5[%c0_50, %c0_51] : memref<288x128xf32, #tpu.memory_space<vmem>>, vector<288x128xf32>
    %44 = arith.addf %43, %42 : vector<288x128xf32>
    %c0_52 = arith.constant 0 : index
    %c0_53 = arith.constant 0 : index
    %45 = vector.load %arg5[%c0_52, %c0_53] : memref<288x128xf32, #tpu.memory_space<vmem>>, vector<288x128xf32>
    tpu.vector_store %arg5[%c0_52, %c0_53], %44 {strides = array<i32>} : memref<288x128xf32, #tpu.memory_space<vmem>>, vector<288x128xf32>,
    %c0_54 = arith.constant 0 : index
    %c36 = arith.constant 36 : index
    %c0_55 = arith.constant 0 : index
    %46 = vector.load %arg1[%c0_54, %c36, %c0_55] : memref<1x342x4xbf16, #tpu.memory_space<vmem>>, vector<1x288x4xbf16>
    %47 = vector.shape_cast %46 : vector<1x288x4xbf16> to vector<288x4xbf16>
    %c6 = arith.constant 6 : index
    %c0_56 = arith.constant 0 : index
    %c0_57 = arith.constant 0 : index
    %48 = vector.load %arg2[%c6, %c0_56, %c0_57] : memref<9x4x128xbf16, #tpu.memory_space<vmem>>, vector<1x4x128xbf16>
    %49 = vector.shape_cast %48 : vector<1x4x128xbf16> to vector<4x128xbf16>
    %cst_58 = arith.constant dense<0.000000e+00> : vector<288x128xf32>
    %50 = tpu.matmul %47, %49, %cst_58 {dimension_numbers = #tpu.dot_dimension_numbers<[1], [0], [0], [1], [0, 0, 1, 1], [], []>} : vector<288x4xbf16>, vector<4x128xbf16>, vector<288x128xf32> -> vector<288x128xf32>
    %c0_59 = arith.constant 0 : index
    %c0_60 = arith.constant 0 : index
    %51 = vector.load %arg5[%c0_59, %c0_60] : memref<288x128xf32, #tpu.memory_space<vmem>>, vector<288x128xf32>
    %52 = arith.addf %51, %50 : vector<288x128xf32>
    %c0_61 = arith.constant 0 : index
    %c0_62 = arith.constant 0 : index
    %53 = vector.load %arg5[%c0_61, %c0_62] : memref<288x128xf32, #tpu.memory_space<vmem>>, vector<288x128xf32>
    tpu.vector_store %arg5[%c0_61, %c0_62], %52 {strides = array<i32>} : memref<288x128xf32, #tpu.memory_space<vmem>>, vector<288x128xf32>,
    %c0_63 = arith.constant 0 : index
    %c37 = arith.constant 37 : index
    %c0_64 = arith.constant 0 : index
    %54 = vector.load %arg1[%c0_63, %c37, %c0_64] : memref<1x342x4xbf16, #tpu.memory_space<vmem>>, vector<1x288x4xbf16>
    %55 = vector.shape_cast %54 : vector<1x288x4xbf16> to vector<288x4xbf16>
    %c7 = arith.constant 7 : index
    %c0_65 = arith.constant 0 : index
    %c0_66 = arith.constant 0 : index
    %56 = vector.load %arg2[%c7, %c0_65, %c0_66] : memref<9x4x128xbf16, #tpu.memory_space<vmem>>, vector<1x4x128xbf16>
    %57 = vector.shape_cast %56 : vector<1x4x128xbf16> to vector<4x128xbf16>
    %cst_67 = arith.constant dense<0.000000e+00> : vector<288x128xf32>
    %58 = tpu.matmul %55, %57, %cst_67 {dimension_numbers = #tpu.dot_dimension_numbers<[1], [0], [0], [1], [0, 0, 1, 1], [], []>} : vector<288x4xbf16>, vector<4x128xbf16>, vector<288x128xf32> -> vector<288x128xf32>
    %c0_68 = arith.constant 0 : index
    %c0_69 = arith.constant 0 : index
    %59 = vector.load %arg5[%c0_68, %c0_69] : memref<288x128xf32, #tpu.memory_space<vmem>>, vector<288x128xf32>
    %60 = arith.addf %59, %58 : vector<288x128xf32>
    %c0_70 = arith.constant 0 : index
    %c0_71 = arith.constant 0 : index
    %61 = vector.load %arg5[%c0_70, %c0_71] : memref<288x128xf32, #tpu.memory_space<vmem>>, vector<288x128xf32>
    tpu.vector_store %arg5[%c0_70, %c0_71], %60 {strides = array<i32>} : memref<288x128xf32, #tpu.memory_space<vmem>>, vector<288x128xf32>,
    %c0_72 = arith.constant 0 : index
    %c38 = arith.constant 38 : index
    %c0_73 = arith.constant 0 : index
    %62 = vector.load %arg1[%c0_72, %c38, %c0_73] : memref<1x342x4xbf16, #tpu.memory_space<vmem>>, vector<1x288x4xbf16>
    %63 = vector.shape_cast %62 : vector<1x288x4xbf16> to vector<288x4xbf16>
    %c8 = arith.constant 8 : index
    %c0_74 = arith.constant 0 : index
    %c0_75 = arith.constant 0 : index
    %64 = vector.load %arg2[%c8, %c0_74, %c0_75] : memref<9x4x128xbf16, #tpu.memory_space<vmem>>, vector<1x4x128xbf16>
    %65 = vector.shape_cast %64 : vector<1x4x128xbf16> to vector<4x128xbf16>
    %cst_76 = arith.constant dense<0.000000e+00> : vector<288x128xf32>
    %66 = tpu.matmul %63, %65, %cst_76 {dimension_numbers = #tpu.dot_dimension_numbers<[1], [0], [0], [1], [0, 0, 1, 1], [], []>} : vector<288x4xbf16>, vector<4x128xbf16>, vector<288x128xf32> -> vector<288x128xf32>
    %c0_77 = arith.constant 0 : index
    %c0_78 = arith.constant 0 : index
    %67 = vector.load %arg5[%c0_77, %c0_78] : memref<288x128xf32, #tpu.memory_space<vmem>>, vector<288x128xf32>
    %68 = arith.addf %67, %66 : vector<288x128xf32>
    %c0_79 = arith.constant 0 : index
    %c0_80 = arith.constant 0 : index
    %69 = vector.load %arg5[%c0_79, %c0_80] : memref<288x128xf32, #tpu.memory_space<vmem>>, vector<288x128xf32>
    tpu.vector_store %arg5[%c0_79, %c0_80], %68 {strides = array<i32>} : memref<288x128xf32, #tpu.memory_space<vmem>>, vector<288x128xf32>,
    %c0_81 = arith.constant 0 : index
    %c0_82 = arith.constant 0 : index
    %70 = vector.load %arg5[%c0_81, %c0_82] : memref<288x128xf32, #tpu.memory_space<vmem>>, vector<288x128xf32>
    %c0_83 = arith.constant 0 : index
    %c0_84 = arith.constant 0 : index
    %71 = vector.load %arg3[%c0_83, %c0_84] : memref<1x128xf32, #tpu.memory_space<vmem>>, vector<1x128xf32>
    %72 = vector.broadcast %71 : vector<1x128xf32> to vector<288x128xf32>
    %73 = arith.addf %70, %72 : vector<288x128xf32>
    %cst_85 = arith.constant 0.000000e+00 : f32
    %74 = vector.broadcast %cst_85 : f32 to vector<288x128xf32>
    %75 = arith.maximumf %73, %74 : vector<288x128xf32>
    %76 = arith.truncf %75 : vector<288x128xf32> to vector<288x128xbf16>
    %c0_86 = arith.constant 0 : index
    %c0_87 = arith.constant 0 : index
    %c0_88 = arith.constant 0 : index
    %77 = vector.load %arg4[%c0_86, %c0_87, %c0_88] : memref<1x288x128xbf16, #tpu.memory_space<vmem>>, vector<1x288x128xbf16>
    %78 = vector.shape_cast %77 : vector<1x288x128xbf16> to vector<288x128xbf16>
    %79 = vector.shape_cast %76 : vector<288x128xbf16> to vector<1x288x128xbf16>
    tpu.vector_store %arg4[%c0_86, %c0_87, %c0_88], %79 {strides = array<i32>} : memref<1x288x128xbf16, #tpu.memory_space<vmem>>, vector<1x288x128xbf16>,
    return
  }
  func.func @transform_0(%arg0: i32) -> (i32, i32, i32) {
    %c0_i32 = arith.constant 0 : i32
    %c0_i32_0 = arith.constant 0 : i32
    %c0_i32_1 = arith.constant 0 : i32
    return %arg0, %c0_i32, %c0_i32_0 : i32, i32, i32
  }
  func.func @transform_1(%arg0: i32) -> (i32, i32, i32) {
    %c0_i32 = arith.constant 0 : i32
    %c0_i32_0 = arith.constant 0 : i32
    %c0_i32_1 = arith.constant 0 : i32
    %c0_i32_2 = arith.constant 0 : i32
    return %c0_i32, %c0_i32_0, %c0_i32_1 : i32, i32, i32
  }
  func.func @transform_2(%arg0: i32) -> (i32, i32) {
    %c0_i32 = arith.constant 0 : i32
    %c0_i32_0 = arith.constant 0 : i32
    %c0_i32_1 = arith.constant 0 : i32
    return %c0_i32, %c0_i32_0 : i32, i32
  }
  func.func @transform_3(%arg0: i32) -> (i32, i32, i32) {
    %c0_i32 = arith.constant 0 : i32
    %c0_i32_0 = arith.constant 0 : i32
    %c0_i32_1 = arith.constant 0 : i32
    return %arg0, %c0_i32, %c0_i32_0 : i32, i32, i32
  }
}

</mosaic_0001>

<bundles_post_ra>
// kernel: tpu_custom_call.1
= control target key start
LH: loop header
LB: loop body
LE: loop exit
PB: predicated region body
PF: predicated region fallthrough
CT: control target
= control target key end

     0   :  { %8 = vsyncpa [#allocation4], 0  ;;  %s6964_s0 = inlined_call_operand.vmem [shape: bf16[2,342,4], index: 0, kind: input, shape index: {}]   ;;  %s6965_s1 = inlined_call_operand.vmem [shape: bf16[9,4,128], index: 1, kind: input, shape index: {}]   ;;  %s6966_s2 = inlined_call_operand.vmem [shape: f32[1,128], index: 2, kind: input, shape index: {}]   ;;  %s6967_s3 = inlined_call_operand.hbm [shape: bf16[2,288,128], index: 3, kind: output, shape index: {}]  }
   0x1   :  { %10 = vsyncpa [#allocation4 + $0x1], 0  ;;  %s5830_s12 = smov 0   ;;  %s5832_s13 = smov 0  }
   0x2   :  { %s5834_s14 = smov 0   ;;  %s5836_s15 = smov 0  }
   0x3 LB: > { %s5851_s16 = sadd.s32 4294967295, %s5806_s15   ;;  %s4600_s17 = sadd.s32 4294967294, %s5806_s15   ;;  %s5806_s15 = sphi %s5836_s15, %s6993_s15   ;;  %s5802_s14 = sphi %s5834_s14, %s6992_s14   ;;  %s5798_s13 = sphi %s5832_s13, %s6991_s13   ;;  %s5794_s12 = sphi %s5830_s12, %s6990_s12  }
   0x4   : > { %s5855_s18 = sadd.s32 1, %s5806_s15   ;;  %s91_s19 = sadd.s32 1, %s5802_s14 }
   0x5   : > { %s88_s20 = ssub.s32 %s5806_s15, %s5855_s18  ;;  %p101_p0 = scmp.ne.s32.totalorder %s5802_s14, %s5798_s13 }
   0x6   : > { %p89_p1 = scmp.eq.s32.totalorder %s88_s20, 0  ;;  %p102_p2 = scmp.eq.s32.totalorder %s5851_s16, 1 }
   0x7   : > { %p107_p3 = scmp.ne.s32.totalorder %s5798_s13, %s5794_s12  ;;  %p108_p4 = scmp.eq.s32.totalorder %s4600_s17, 1 }
   0x8   : > { %s5866_s21 = scalar_select %p89_p1, %s5802_s14, %s91_s19  }
   0x9   : > { %p5868_p5 = por %p102_p2, %p101_p0  ;;  %p5872_p6 = por %p108_p4, %p107_p3 }
   0xa   : > { %p4603_p7 = scmp.ge.s32.totalorder %s5806_s15, 1  ;;  %p140_p8 = scmp.lt.s32.totalorder %s5806_s15, 3 }
   0xc   : > { %p141_p9 = pnand %p4603_p7, %p140_p8 }
   0xe   : > { %144 = sbr.rel (%p141_p9) target bundleno = 823 (0x337), region = 32 }
  0x13   : > { %v206_v0 = vld [vmem:[%s6965_s1] sm:$0x3]  ;;  %vm352_vm0 = vcmask 1041408   ;;  %p164_p10 = scmp.lt.s32.totalorder %s5851_s16, 1  ;;  %v4786_v2 = vld [vmem:[%s6965_s1 + $0x4] sm:$0x3] }
  0x14   : > { %v354_v1 = vsel %vm352_vm0, %v206_v0, 0  ;;  %v4695_v3 = vld [vmem:[%s6965_s1 + $0x2] sm:$0x3]  ;;  %v1261_v4 = vsel %vm352_vm0, %v4786_v2, 0  ;;  %v4968_v6 = vld [vmem:[%s6965_s1 + $0x8] sm:$0x3] }
  0x15   : > { %5695 = vmatpush.bf16.msra.mxu1 %v354_v1  ;;  %5696 = vmatpush.bf16.msra.mxu2 %v354_v1  ;;  %s165_s30 = scalar_select %p164_p10, %s5851_s16, 1  ;;  %v827_v5 = vsel %vm352_vm0, %v4695_v3, 0  ;;  %v2261_v7 = vsel %vm352_vm0, %v4968_v6, 0  ;;  %vm297_vm1 = vcmask 31744   ;;  %v4877_v12 = vld [vmem:[%s6965_s1 + $0x6] sm:$0x3] }
  0x16   : > { %363 = vmatpush.bf16.msra.mxu0 %v354_v1  ;;  %5697 = vmatpush.bf16.msra.mxu3 %v354_v1  ;;  %v1694_v13 = vsel %vm352_vm0, %v4877_v12, 0  ;;  %vm1168_vm2 = vcmask 1046528   ;;  %v5150_v32 = vld [vmem:[%s6965_s1 + $0xc] sm:$0x3]  ;;  %v5241_v34 = vld [vmem:[%s6965_s1 + $0xe] sm:$0x3] }
  0x17   : > { %s5699_s6 = smul.u32 172, %s165_s30  ;;  %v3128_v33 = vsel %vm352_vm0, %v5150_v32, 0  ;;  %v5059_v35 = vld [vmem:[%s6965_s1 + $0xa] sm:$0x3]  ;;  %v3695_v36 = vsel %vm352_vm0, %v5241_v34, 0  ;;  %vm2602_vm6 = vcmask 1045504  }
  0x18   : > { %v2695_v37 = vsel %vm352_vm0, %v5059_v35, 0  ;;  %v5332_v38 = vld [vmem:[%s6965_s1 + $0x10] sm:$0x3]  ;;  %vm623_vm3 = vsmask.f32 7424  ;;  %vm4036_vm7 = vcmask 1044480  }
  0x19   : > { %1270 = vmatpush.bf16.msrb.mxu2 %v1261_v4  ;;  %836 = vmatpush.bf16.msrb.mxu1 %v827_v5  ;;  %s5899_s9 = scalar_lea.vmem %s6964_s0, %s5699_s6  ;;  %v4129_v39 = vsel %vm352_vm0, %v5332_v38, 0  ;;  %vm2035_vm4 = vsmask.f32 6400  ;;  %vm3469_vm5 = vsmask.f32 5376  ;;  %s161_s4 = sand.u32 1, %s5798_s13  }
  0x1a   : > { %2270 = vmatpush.bf16.msrb.mxu0 %v2261_v7  ;;  %v5431_v8 = vld [vmem:[%s5899_s9 + $0x28] sm:$0xff]  ;;  %v5436_v9 = vld [vmem:[%s5899_s9 + $0x50] sm:$0xff]  ;;  %v5426_v10 = vld [vmem:[%s5899_s9] sm:$0xff]  ;;  %1703 = vmatpush.bf16.msrb.mxu3 %v1694_v13  ;;  %s5698_s5 = smul.u32 144, %s161_s4  ;;  %s5764_s28 = scalar_lea.hbm %s6967_s3, 288 }
  0x1b   : > { %4682 = vmatmul.msk.bf16.vlgmr.msra.gmra.mxu1 %vm297_vm1, %v5431_v8  ;;  %4687 = vmatmul.msk.bf16.vlgmr.msra.gmra.mxu2 %vm297_vm1, %v5436_v9  ;;  %v5441_v11 = vld [vmem:[%s5899_s9 + $0x78] sm:$0xff]  ;;  %v5432_v14 = vld [vmem:[%s5899_s9 + $0x30] sm:$0xff]  ;;  %v5427_v16 = vld [vmem:[%s5899_s9 + $0x8] sm:$0xff] }
  0x1c   : > { %4677 = vmatmul.msk.bf16.vlgmr.msra.gmra.mxu0 %vm297_vm1, %v5426_v10  ;;  %4692 = vmatmul.msk.bf16.vlgmr.msra.gmra.mxu3 %vm297_vm1, %v5441_v11  ;;  %v5437_v15 = vld [vmem:[%s5899_s9 + $0x58] sm:$0xff]  ;;  %v5442_v17 = vld [vmem:[%s5899_s9 + $0x80] sm:$0xff]  ;;  %v5428_v20 = vld [vmem:[%s5899_s9 + $0x10] sm:$0xff]  ;;  %s6675_s6 = scalar_lea.vmem [#allocation3], %s5698_s5 }
  0x1d   : > { %v5433_v18 = vld [vmem:[%s5899_s9 + $0x38] sm:$0xff]  ;;  %v5438_v19 = vld [vmem:[%s5899_s9 + $0x60] sm:$0xff]  ;;  %v5443_v21 = vld [vmem:[%s5899_s9 + $0x88] sm:$0xff]  ;;  %3137 = vmatpush.bf16.msra.mxu2 %v3128_v33  ;;  %2704 = vmatpush.bf16.msra.mxu1 %v2695_v37  ;;  %s4535_s19 = sshll.u32 %s6675_s6, 4  ;;  %s4536_s19 = int_to_ptr.vmem [resolvable:$true] %s4535_s19 }
  0x1e   : > { %v4880_v22 = vld [vmem:[%s5899_s9 + $0x8] sm:$0xe]  ;;  %v5480_v23 = vld [vmem:[%s5899_s9 + $0x8] sm:$0xf0]  ;;  %v5481_v24 = vld [vmem:[%s5899_s9 + $0x10] sm:$0xff]  ;;  %3704 = vmatpush.bf16.msra.mxu3 %v3695_v36  ;;  %4138 = vmatpush.bf16.msra.mxu0 %v4129_v39 }
  0x1f   : > { %v4881_v25 = vor.u32 %v5480_v23, %v4880_v22  ;;  %v1603_v27 = vrot.slane %v5481_v24, 1  ;;  %v5434_v28 = vld [vmem:[%s5899_s9 + $0x40] sm:$0xff]  ;;  %v5439_v29 = vld [vmem:[%s5899_s9 + $0x68] sm:$0xff]  ;;  %v5429_v30 = vld [vmem:[%s5899_s9 + $0x18] sm:$0xff] }
  0x20   : > { %v5482_v40 = vld [vmem:[%s5899_s9 + $0x18] sm:$0xff]  ;;  %v4971_v41 = vld [vmem:[%s5899_s9 + $0x8] sm:$0xe]  ;;  %v5498_v42 = vld [vmem:[%s5899_s9 + $0x8] sm:$0xf0] }
  0x21   : > { %v1602_v26 = vrot.slane %v4881_v25, 1  ;;  %v1605_v43 = vrot.slane %v5482_v40, 1  ;;  %v5435_v44 = vld [vmem:[%s5899_s9 + $0x48] sm:$0xff]  ;;  %v5440_v45 = vld [vmem:[%s5899_s9 + $0x70] sm:$0xff]  ;;  %v5430_v46 = vld [vmem:[%s5899_s9 + $0x20] sm:$0xff]  ;;  %v4972_v49 = vor.u32 %v5498_v42, %v4971_v41 }
  0x22   : > { %v5444_v47 = vld [vmem:[%s5899_s9] sm:$0xff]  ;;  %v5499_v48 = vld [vmem:[%s5899_s9 + $0x10] sm:$0xff]  ;;  %v5445_v51 = vld [vmem:[%s5899_s9 + $0x8] sm:$0xff] }
  0x23   : > { %v1604_v31 = vsel %vm1168_vm2, %v1602_v26, %v1603_v27  ;;  %v1606_v50 = vsel %vm1168_vm2, %v1603_v27, %v1605_v43  ;;  %v627_v52 = vshll.u32 %v5444_v47, 16  ;;  %v4789_v53 = vld [vmem:[%s5899_s9] sm:$0xe]  ;;  %v5462_v54 = vld [vmem:[%s5899_s9] sm:$0xf0]  ;;  %v2037_v55 = vshrl.u32 %v4972_v49, 16 }
  0x24   : > { %v2040_v56 = vshll.u32 %v4972_v49, 16  ;;  %v2045_v57 = vshrl.u32 %v5499_v48, 16  ;;  %v2048_v58 = vshll.u32 %v5499_v48, 16  ;;  %v625_v59 = vshrl.u32 %v5444_v47, 16  ;;  %v5463_v62 = vld [vmem:[%s5899_s9 + $0x8] sm:$0xff]  ;;  %v5483_v4 = vld [vmem:[%s5899_s9 + $0x20] sm:$0xff] }
  0x25   : > { %v629_v60 = vrot.slane %v627_v52, 1  ;;  %v632_v61 = vshll.u32 %v5445_v51, 16  ;;  %v4790_v63 = vor.u32 %v5462_v54, %v4789_v53  ;;  %v2039_v0 = vrot.slane %v2037_v55, 1  ;;  %v5464_v22 = vld [vmem:[%s5899_s9 + $0x10] sm:$0xff]  ;;  %v5484_v25 = vld [vmem:[%s5899_s9 + $0x28] sm:$0xff]  ;;  %v5501_v34 = vld [vmem:[%s5899_s9 + $0x20] sm:$0xff] }
  0x26   : > { %v2042_v1 = vrot.slane %v2040_v56, 2  ;;  %v2047_v2 = vrot.slane %v2045_v57, 1  ;;  %v2050_v3 = vrot.slane %v2048_v58, 2  ;;  %v1170_v8 = vrot.slane %v5463_v62, 1  ;;  %v5447_v36 = vld [vmem:[%s5899_s9 + $0x18] sm:$0xff]  ;;  %v5502_v53 = vld [vmem:[%s5899_s9 + $0x28] sm:$0xff] }
  0x27   : > { %v630_v5 = vor.u32 %v629_v60, %v625_v59  ;;  %v634_v6 = vrot.slane %v632_v61, 1  ;;  %v1169_v7 = vrot.slane %v4790_v63, 1  ;;  %v1607_v11 = vrot.slane %v5483_v4, 1  ;;  %v5465_v41 = vld [vmem:[%s5899_s9 + $0x18] sm:$0xff]  ;;  %v5448_v55 = vld [vmem:[%s5899_s9 + $0x20] sm:$0xff] }
  0x28   : > { %v2043_v9 = vor.u32 %v2042_v1, %v2039_v0  ;;  %v2051_v10 = vor.u32 %v2050_v3, %v2047_v2  ;;  %v2063_v37 = vshrl.u32 %v5501_v34, 16  ;;  %v2066_v38 = vshll.u32 %v5501_v34, 16  ;;  %v5466_v60 = vld [vmem:[%s5899_s9 + $0x20] sm:$0xff]  ;;  %v5486_v63 = vld [vmem:[%s5899_s9 + $0x38] sm:$0xff] }
  0x29   : > { %v635_v12 = vsel %vm623_vm3, %v630_v5, %v634_v6  ;;  %v1171_v13 = vsel %vm1168_vm2, %v1169_v7, %v1170_v8  ;;  %v648_v40 = vshll.u32 %v5447_v36, 16  ;;  %v1174_v47 = vrot.slane %v5465_v41, 1 }
  0x2a   : > { %v2065_v42 = vrot.slane %v2063_v37, 1  ;;  %v2072_v56 = vshrl.u32 %v5502_v53, 16  ;;  %v2075_v57 = vshll.u32 %v5502_v53, 16  ;;  %v652_v58 = vshrl.u32 %v5447_v36, 16  ;;  %v5504_v37 = vld [vmem:[%s5899_s9 + $0x38] sm:$0xff] }
  0x2b   : > { %4683 = vmatmul.msk.bf16.gmra.mxu1 %vm297_vm1, %v5432_v14  ;;  %4688 = vmatmul.msk.bf16.gmra.mxu2 %vm297_vm1, %v5437_v15  ;;  %v2052_v14 = vsel %vm2035_vm4, %v2043_v9, %v2051_v10  ;;  %v5500_v15 = vld [vmem:[%s5899_s9 + $0x18] sm:$0xff]  ;;  %v656_v59 = vshll.u32 %v5448_v55, 16  ;;  %v1176_v2 = vrot.slane %v5466_v60, 1  ;;  %v1613_v4 = vrot.slane %v5486_v63, 1 }
  0x2c   : > { %4678 = vmatmul.msk.bf16.gmra.mxu0 %vm297_vm1, %v5427_v16  ;;  %4693 = vmatmul.msk.bf16.gmra.mxu3 %vm297_vm1, %v5442_v17  ;;  %v1608_v16 = vsel %vm1168_vm2, %v1605_v43, %v1607_v11  ;;  %v5446_v17 = vld [vmem:[%s5899_s9 + $0x10] sm:$0xff]  ;;  %v2068_v43 = vrot.slane %v2066_v38, 2  ;;  %v2074_v61 = vrot.slane %v2072_v56, 1  ;;  %v2077_v62 = vrot.slane %v2075_v57, 2 }
  0x2d   : > { %v644_v39 = vshrl.u32 %v5446_v17, 16  ;;  %v658_v1 = vrot.slane %v656_v59, 1  ;;  %v1177_v7 = vsel %vm1168_vm2, %v1174_v47, %v1176_v2  ;;  %v2093_v41 = vshll.u32 %v5504_v37, 16 }
  0x2e   : > { %v2069_v48 = vor.u32 %v2068_v43, %v2065_v42  ;;  %v2078_v3 = vor.u32 %v2077_v62, %v2074_v61 }
  0x30   : > { %v2079_v9 = vsel %vm2035_vm4, %v2069_v48, %v2078_v3 }
  0x3b   : > { %4684 = vmatmul.msk.bf16.gmra.mxu1 %vm297_vm1, %v5433_v18  ;;  %4689 = vmatmul.msk.bf16.gmra.mxu2 %vm297_vm1, %v5438_v19  ;;  %v2054_v18 = vshrl.u32 %v5500_v15, 16  ;;  %v2057_v19 = vshll.u32 %v5500_v15, 16 }
  0x3c   : > { %4679 = vmatmul.msk.bf16.gmra.mxu0 %vm297_vm1, %v5428_v20  ;;  %4694 = vmatmul.msk.bf16.gmra.mxu3 %vm297_vm1, %v5443_v21  ;;  %v636_v20 = vshrl.u32 %v5445_v51, 16  ;;  %v640_v21 = vshll.u32 %v5446_v17, 16  ;;  %v660_v17 = vshrl.u32 %v5448_v55, 16 }
  0x3d   : > { %v2056_v23 = vrot.slane %v2054_v18, 1  ;;  %v2059_v24 = vrot.slane %v2057_v19, 2  ;;  %v5467_v19 = vld [vmem:[%s5899_s9 + $0x28] sm:$0xff] }
  0x3e   : > { %v638_v26 = vor.u32 %v636_v20, %v634_v6  ;;  %v642_v27 = vrot.slane %v640_v21, 1 }
  0x4b   : > { %4685 = vmatmul.msk.bf16.gmra.mxu1 %vm297_vm1, %v5434_v28  ;;  %4690 = vmatmul.msk.bf16.gmra.mxu2 %vm297_vm1, %v5439_v29  ;;  %v1172_v28 = vrot.slane %v5464_v22, 1  ;;  %v2060_v29 = vor.u32 %v2059_v24, %v2056_v23  ;;  %v5487_v24 = vld [vmem:[%s5899_s9 + $0x40] sm:$0xff] }
  0x4c   : > { %4680 = vmatmul.msk.bf16.gmra.mxu0 %vm297_vm1, %v5429_v30  ;;  %4950 = vmatmul.msk.bf16.vlgmr.msrb.gmra.mxu3 %vm297_vm1, %v1604_v31  ;;  %v1609_v30 = vrot.slane %v5484_v25, 1  ;;  %v643_v31 = vsel %vm623_vm3, %v638_v26, %v642_v27  ;;  %v662_v25 = vor.u32 %v660_v17, %v658_v1 }
  0x4d   : > { %v1173_v32 = vsel %vm1168_vm2, %v1170_v8, %v1172_v28  ;;  %v2061_v33 = vsel %vm2035_vm4, %v2051_v10, %v2060_v29  ;;  %v1175_v51 = vsel %vm1168_vm2, %v1172_v28, %v1174_v47  ;;  %v2070_v52 = vsel %vm2035_vm4, %v2060_v29, %v2069_v48  ;;  %v5503_v10 = vld [vmem:[%s5899_s9 + $0x30] sm:$0xff] }
  0x4e   : > { %v1610_v35 = vsel %vm1168_vm2, %v1607_v11, %v1609_v30 }
  0x5b   : > { %4686 = vmatmul.msk.bf16.gmra.mxu1 %vm297_vm1, %v5435_v44  ;;  %4691 = vmatmul.msk.bf16.gmra.mxu2 %vm297_vm1, %v5440_v45  ;;  %v5485_v44 = vld [vmem:[%s5899_s9 + $0x30] sm:$0xff]  ;;  %v646_v45 = vor.u32 %v644_v39, %v642_v27  ;;  %v1178_v27 = vrot.slane %v5467_v19, 1 }
  0x5c   : > { %4681 = vmatmul.msk.bf16.gmra.mxu0 %vm297_vm1, %v5430_v46  ;;  %4951 = vmatmul.msk.bf16.gmra.mxu3 %vm297_vm1, %v1606_v50  ;;  %v650_v46 = vrot.slane %v648_v40, 1  ;;  %v1611_v49 = vrot.slane %v5485_v44, 1  ;;  %v5450_v39 = vld [vmem:[%s5899_s9 + $0x30] sm:$0xff]  ;;  %v2090_v40 = vshrl.u32 %v5504_v37, 16  ;;  %v5506_v37 = vld [vmem:[%s5899_s9 + $0x48] sm:$0xff] }
  0x5e   : > { %v651_v50 = vsel %vm623_vm3, %v646_v45, %v650_v46  ;;  %v1612_v54 = vsel %vm1168_vm2, %v1609_v30, %v1611_v49  ;;  %v654_v0 = vor.u32 %v652_v58, %v650_v46  ;;  %v1614_v11 = vsel %vm1168_vm2, %v1611_v49, %v1613_v4  ;;  %v5468_v46 = vld [vmem:[%s5899_s9 + $0x30] sm:$0xff] }
  0x5f   : > { %v1615_v30 = vrot.slane %v5487_v24, 1  ;;  %v672_v45 = vshll.u32 %v5450_v39, 16  ;;  %v2092_v49 = vrot.slane %v2090_v40, 1  ;;  %v2108_v40 = vshrl.u32 %v5506_v37, 16 }
  0x60   : > { %v659_v6 = vsel %vm623_vm3, %v654_v0, %v658_v1  ;;  %v5505_v0 = vld [vmem:[%s5899_s9 + $0x40] sm:$0xff] }
  0x61   : > { %v1616_v38 = vsel %vm1168_vm2, %v1613_v4, %v1615_v30  ;;  %v674_v53 = vrot.slane %v672_v45, 1  ;;  %v2102_v4 = vshll.u32 %v5505_v0, 16 }
  0x63   : > { %v2104_v17 = vrot.slane %v2102_v4, 2 }
  0x6b   : > { %4768 = vmatmul.msk.bf16.vlgmr.msrb.gmra.mxu1 %vm297_vm1, %v635_v12  ;;  %4859 = vmatmul.msk.bf16.vlgmr.msrb.gmra.mxu2 %vm297_vm1, %v1171_v13  ;;  %v5449_v12 = vld [vmem:[%s5899_s9 + $0x28] sm:$0xff]  ;;  %v2081_v13 = vshrl.u32 %v5503_v10, 16 }
  0x6c   : > { %5041 = vmatmul.msk.bf16.vlgmr.msrb.gmra.mxu0 %vm297_vm1, %v2052_v14  ;;  %4952 = vmatmul.msk.bf16.gmra.mxu3 %vm297_vm1, %v1608_v16  ;;  %v2084_v14 = vshll.u32 %v5503_v10, 16  ;;  %v664_v18 = vshll.u32 %v5449_v12, 16  ;;  %v668_v44 = vshrl.u32 %v5449_v12, 16 }
  0x6d   : > { %v2083_v22 = vrot.slane %v2081_v13, 1 }
  0x6e   : > { %v2086_v23 = vrot.slane %v2084_v14, 2  ;;  %v666_v26 = vrot.slane %v664_v18, 1  ;;  %v5489_v18 = vld [vmem:[%s5899_s9 + $0x50] sm:$0xff] }
  0x70   : > { %v2087_v28 = vor.u32 %v2086_v23, %v2083_v22 }
  0x72   : > { %v2088_v36 = vsel %vm2035_vm4, %v2078_v3, %v2087_v28  ;;  %v2099_v3 = vshrl.u32 %v5505_v0, 16 }
  0x74   : > { %v2101_v14 = vrot.slane %v2099_v3, 1 }
  0x76   : > { %v2105_v24 = vor.u32 %v2104_v17, %v2101_v14  ;;  %v5507_v14 = vld [vmem:[%s5899_s9 + $0x50] sm:$0xff] }
  0x7b   : > { %4769 = vmatmul.msk.bf16.gmra.mxu1 %vm297_vm1, %v643_v31  ;;  %4860 = vmatmul.msk.bf16.gmra.mxu2 %vm297_vm1, %v1173_v32  ;;  %v667_v32 = vsel %vm623_vm3, %v662_v25, %v666_v26 }
  0x7c   : > { %5042 = vmatmul.msk.bf16.gmra.mxu0 %vm297_vm1, %v2061_v33  ;;  %4953 = vmatmul.msk.bf16.gmra.mxu3 %vm297_vm1, %v1610_v35  ;;  %v1179_v33 = vsel %vm1168_vm2, %v1176_v2, %v1178_v27  ;;  %v5451_v2 = vld [vmem:[%s5899_s9 + $0x38] sm:$0xff] }
  0x7d   : > { %v680_v10 = vshll.u32 %v5451_v2, 16 }
  0x7f   : > { %v682_v22 = vrot.slane %v680_v10, 1 }
  0x8b   : > { %4770 = vmatmul.msk.bf16.gmra.mxu1 %vm297_vm1, %v651_v50  ;;  %4861 = vmatmul.msk.bf16.gmra.mxu2 %vm297_vm1, %v1175_v51  ;;  %v2095_v50 = vrot.slane %v2093_v41, 2  ;;  %v5488_v51 = vld [vmem:[%s5899_s9 + $0x48] sm:$0xff]  ;;  %v2111_v41 = vshll.u32 %v5506_v37, 16 }
  0x8c   : > { %5043 = vmatmul.msk.bf16.gmra.mxu0 %vm297_vm1, %v2070_v52  ;;  %4954 = vmatmul.msk.bf16.gmra.mxu3 %vm297_vm1, %v1612_v54  ;;  %v670_v52 = vor.u32 %v668_v44, %v666_v26  ;;  %v1180_v54 = vrot.slane %v5468_v46, 1  ;;  %v1617_v57 = vrot.slane %v5488_v51, 1  ;;  %v1619_v26 = vrot.slane %v5489_v18, 1  ;;  %v5453_v18 = vld [vmem:[%s5899_s9 + $0x48] sm:$0xff] }
  0x8d   : > { %v2096_v55 = vor.u32 %v2095_v50, %v2092_v49  ;;  %v684_v46 = vshrl.u32 %v5451_v2, 16  ;;  %v5470_v50 = vld [vmem:[%s5899_s9 + $0x40] sm:$0xff] }
  0x8e   : > { %v675_v59 = vsel %vm623_vm3, %v670_v52, %v674_v53  ;;  %v1181_v60 = vsel %vm1168_vm2, %v1178_v27, %v1180_v54  ;;  %v1618_v1 = vsel %vm1168_vm2, %v1615_v30, %v1617_v57 }
  0x8f   : > { %v2097_v63 = vsel %vm2035_vm4, %v2087_v28, %v2096_v55 }
  0x98   : > { %v6010_v5 = vpop.f32.mrf.mxu1 }
  0x99   : > { %v6014_v8 = vpop.f32.mrf.mxu0 }
  0x9b   : > { %4771 = vmatmul.msk.bf16.gmra.mxu1 %vm297_vm1, %v659_v6  ;;  %4862 = vmatmul.msk.bf16.gmra.mxu2 %vm297_vm1, %v1177_v7 }
  0x9c   : > { %5044 = vmatmul.msk.bf16.gmra.mxu0 %vm297_vm1, %v2079_v9  ;;  %4955 = vmatmul.msk.bf16.gmra.mxu3 %vm297_vm1, %v1614_v11  ;;  %v676_v9 = vshrl.u32 %v5450_v39, 16  ;;  %v5469_v11 = vld [vmem:[%s5899_s9 + $0x38] sm:$0xff]  ;;  %v5452_v39 = vld [vmem:[%s5899_s9 + $0x40] sm:$0xff] }
  0x9d   : > { %v1182_v23 = vrot.slane %v5469_v11, 1  ;;  %v688_v49 = vshll.u32 %v5452_v39, 16 }
  0x9e   : > { %v6024_v15 = vpop.f32.mrf.mxu2  ;;  %v678_v19 = vor.u32 %v676_v9, %v674_v53  ;;  %v2110_v53 = vrot.slane %v2108_v40, 1 }
  0x9f   : > { %v6029_v20 = vpop.f32.mrf.mxu3  ;;  %v1183_v30 = vsel %vm1168_vm2, %v1180_v54, %v1182_v23  ;;  %v2113_v54 = vrot.slane %v2111_v41, 2  ;;  %v5491_v41 = vld [vmem:[%s5899_s9 + $0x60] sm:$0xff] }
  0xa0   : > { %v6026_v16 = vpop.f32.mrf.mxu1  ;;  %v683_v28 = vsel %vm623_vm3, %v678_v19, %v682_v22  ;;  %v2117_v19 = vshrl.u32 %v5507_v14, 16 }
  0xa1   : > { %v6031_v21 = vpop.f32.mrf.mxu0 }
  0xa6   : > { %v6034_v29 = vpop.f32.mrf.mxu2 }
  0xa7   : > { %v6040_v34 = vpop.f32.mrf.mxu3 }
  0xa8   : > { %v6036_v31 = vpop.f32.mrf.mxu1 }
  0xa9   : > { %v6042_v35 = vpop.f32.mrf.mxu0 }
  0xab   : > { %4772 = vmatmul.msk.bf16.gmra.mxu1 %vm297_vm1, %v667_v32  ;;  %4863 = vmatmul.msk.bf16.gmra.mxu2 %vm297_vm1, %v1179_v33 }
  0xac   : > { %5045 = vmatmul.msk.bf16.gmra.mxu0 %vm297_vm1, %v2088_v36  ;;  %4956 = vmatmul.msk.bf16.gmra.mxu3 %vm297_vm1, %v1616_v38  ;;  %v2106_v36 = vsel %vm2035_vm4, %v2096_v55, %v2105_v24  ;;  %v1620_v38 = vsel %vm1168_vm2, %v1617_v57, %v1619_v26  ;;  %v5490_v55 = vld [vmem:[%s5899_s9 + $0x58] sm:$0xff]  ;;  %v686_v57 = vor.u32 %v684_v46, %v682_v22  ;;  %v2120_v22 = vshll.u32 %v5507_v14, 16 }
  0xae   : > { %v6052_v42 = vpop.f32.mrf.mxu2  ;;  %v2122_v40 = vrot.slane %v2120_v22, 2 }
  0xaf   : > { %v6057_v47 = vpop.f32.mrf.mxu3 }
  0xb0   : > { %v6054_v43 = vpop.f32.mrf.mxu1  ;;  %6971 = vst [vmem:[#allocation6_spill] sm:$0xff] %v6057_v47 }
  0xb1   : > { %v6059_v48 = vpop.f32.mrf.mxu0 }
  0xb6   : > { %v6062_v56 = vpop.f32.mrf.mxu2 }
  0xb7   : > { %v6068_v61 = vpop.f32.mrf.mxu3 }
  0xb8   : > { %v6064_v58 = vpop.f32.mrf.mxu1  ;;  %6972 = vst [vmem:[#allocation7_spill] sm:$0xff] %v6068_v61 }
  0xb9   : > { %v6070_v62 = vpop.f32.mrf.mxu0 }
  0xbb   : > { %4773 = vmatmul.msk.bf16.gmra.mxu1 %vm297_vm1, %v675_v59  ;;  %4864 = vmatmul.msk.bf16.gmra.mxu2 %vm297_vm1, %v1181_v60  ;;  %v690_v59 = vrot.slane %v688_v49, 1  ;;  %v1184_v60 = vrot.slane %v5470_v50, 1 }
  0xbc   : > { %5046 = vmatmul.msk.bf16.gmra.mxu0 %vm297_vm1, %v2097_v63  ;;  %4957 = vmatmul.msk.bf16.gmra.mxu3 %vm297_vm1, %v1618_v1  ;;  %v2114_v63 = vor.u32 %v2113_v54, %v2110_v53  ;;  %v1621_v1 = vrot.slane %v5490_v55, 1  ;;  %v1623_v55 = vrot.slane %v5491_v41, 1 }
  0xbd   : > { %v691_v2 = vsel %vm623_vm3, %v686_v57, %v690_v59  ;;  %v1185_v4 = vsel %vm1168_vm2, %v1182_v23, %v1184_v60 }
  0xbe   : > { %v6080_v6 = vpop.f32.mrf.mxu2  ;;  %v2115_v11 = vsel %vm2035_vm4, %v2105_v24, %v2114_v63  ;;  %v1622_v17 = vsel %vm1168_vm2, %v1619_v26, %v1621_v1  ;;  %v692_v24 = vshrl.u32 %v5452_v39, 16 }
  0xbf   : > { %v6085_v12 = vpop.f32.mrf.mxu3 }
  0xc0   : > { %v6082_v7 = vpop.f32.mrf.mxu1  ;;  %6973 = vst [vmem:[#allocation8_spill] sm:$0xff] %v6085_v12  ;;  %v694_v46 = vor.u32 %v692_v24, %v690_v59  ;;  %v1624_v59 = vsel %vm1168_vm2, %v1621_v1, %v1623_v55  ;;  %v5472_v1 = vld [vmem:[%s5899_s9 + $0x50] sm:$0xff] }
  0xc1   : > { %v6087_v13 = vpop.f32.mrf.mxu0 }
  0xc6   : > { %v6090_v25 = vpop.f32.mrf.mxu2 }
  0xc7   : > { %v6096_v32 = vpop.f32.mrf.mxu3 }
  0xc8   : > { %v6092_v27 = vpop.f32.mrf.mxu1  ;;  %6974 = vst [vmem:[#allocation9_spill] sm:$0xff] %v6096_v32  ;;  %v5492_v32 = vld [vmem:[%s5899_s9 + $0x68] sm:$0xff] }
  0xc9   : > { %v6098_v33 = vpop.f32.mrf.mxu0 }
  0xcb   : > { %4774 = vmatmul.msk.bf16.gmra.mxu1 %vm297_vm1, %v683_v28  ;;  %4865 = vmatmul.msk.bf16.gmra.mxu2 %vm297_vm1, %v1183_v30  ;;  %v696_v30 = vshll.u32 %v5453_v18, 16 }
  0xcc   : > { %5047 = vmatmul.msk.bf16.gmra.mxu0 %vm297_vm1, %v2106_v36  ;;  %4958 = vmatmul.msk.bf16.gmra.mxu3 %vm297_vm1, %v1620_v38  ;;  %v5471_v36 = vld [vmem:[%s5899_s9 + $0x48] sm:$0xff]  ;;  %v2119_v38 = vrot.slane %v2117_v19, 1  ;;  %v5454_v19 = vld [vmem:[%s5899_s9 + $0x50] sm:$0xff] }
  0xcd   : > { %v698_v49 = vrot.slane %v696_v30, 1  ;;  %v1186_v50 = vrot.slane %v5471_v36, 1 }
  0xce   : > { %v6108_v44 = vpop.f32.mrf.mxu2  ;;  %v2123_v53 = vor.u32 %v2122_v40, %v2119_v38  ;;  %v700_v38 = vshrl.u32 %v5453_v18, 16  ;;  %v704_v40 = vshll.u32 %v5454_v19, 16 }
  0xcf   : > { %v6113_v51 = vpop.f32.mrf.mxu3  ;;  %v699_v39 = vsel %vm623_vm3, %v694_v46, %v698_v49 }
  0xd0   : > { %v6110_v45 = vpop.f32.mrf.mxu1  ;;  %v2124_v14 = vsel %vm2035_vm4, %v2114_v63, %v2123_v53 }
  0xd1   : > { %v6115_v52 = vpop.f32.mrf.mxu0 }
  0xd6   : > { %v6118_v0 = vpop.f32.mrf.mxu2 }
  0xd7   : > { %v6124_v9 = vpop.f32.mrf.mxu3 }
  0xd8   : > { %v6120_v3 = vpop.f32.mrf.mxu1 }
  0xd9   : > { %v6126_v10 = vpop.f32.mrf.mxu0 }
  0xdb   : > { %4775 = vmatmul.msk.bf16.gmra.mxu1 %vm297_vm1, %v691_v2  ;;  %4866 = vmatmul.msk.bf16.gmra.mxu2 %vm297_vm1, %v1185_v4  ;;  %v1187_v2 = vsel %vm1168_vm2, %v1184_v60, %v1186_v50 }
  0xdc   : > { %5048 = vmatmul.msk.bf16.gmra.mxu0 %vm297_vm1, %v2115_v11  ;;  %4959 = vmatmul.msk.bf16.gmra.mxu3 %vm297_vm1, %v1622_v17  ;;  %v5508_v17 = vld [vmem:[%s5899_s9 + $0x58] sm:$0xff] }
  0xdd   : > { %v2126_v60 = vshrl.u32 %v5508_v17, 16  ;;  %v2129_v24 = vshll.u32 %v5508_v17, 16  ;;  %v1188_v17 = vrot.slane %v5472_v1, 1 }
  0xde   : > { %v6136_v23 = vpop.f32.mrf.mxu2 }
  0xdf   : > { %v6141_v26 = vpop.f32.mrf.mxu3 }
  0xe0   : > { %v6138_v28 = vpop.f32.mrf.mxu1 }
  0xe1   : > { %v6143_v37 = vpop.f32.mrf.mxu0 }
  0xe6   : > { %v6146_v54 = vpop.f32.mrf.mxu2 }
  0xe7   : > { %v6150_v4 = vpop.f32.mrf.mxu3 }
  0xe8   : > { %v838_v57 = vpop.f32.mrf.mxu1 }
  0xe9   : > { %v2272_v11 = vpop.f32.mrf.mxu0  ;;  %v964_v22 = vadd.f32 %v838_v57, %v6014_v8  ;;  %v702_v8 = vor.u32 %v700_v38, %v698_v49  ;;  %v706_v57 = vrot.slane %v704_v40, 1  ;;  %v5509_v38 = vld [vmem:[%s5899_s9 + $0x60] sm:$0xff] }
  0xeb   : > { %4776 = vmatmul.msk.bf16.gmra.mxu1 %vm297_vm1, %v699_v39  ;;  %4867 = vmatmul.msk.bf16.gmra.mxu2 %vm297_vm1, %v1187_v2  ;;  %v2128_v2 = vrot.slane %v2126_v60, 1  ;;  %v1189_v60 = vsel %vm1168_vm2, %v1186_v50, %v1188_v17  ;;  %v5455_v50 = vld [vmem:[%s5899_s9 + $0x58] sm:$0xff] }
  0xec   : > { %5049 = vmatmul.msk.bf16.gmra.mxu0 %vm297_vm1, %v2124_v14  ;;  %4960 = vmatmul.msk.bf16.gmra.mxu3 %vm297_vm1, %v1624_v59  ;;  %v2131_v14 = vrot.slane %v2129_v24, 2 }
  0xee   : > { %v1272_v30 = vpop.f32.mrf.mxu2 }
  0xef   : > { %v1398_v63 = vadd.f32 %v1272_v30, %v964_v22  ;;  %v6162_v41 = vpop.f32.mrf.mxu3  ;;  %v2132_v22 = vor.u32 %v2131_v14, %v2128_v2  ;;  %v1625_v30 = vrot.slane %v5492_v32, 1  ;;  %v5473_v2 = vld [vmem:[%s5899_s9 + $0x58] sm:$0xff] }
  0xf0   : > { %v840_v36 = vpop.f32.mrf.mxu1 }
  0xf1   : > { %v1831_v46 = vadd.f32 %v6113_v51, %v1398_v63  ;;  %v2274_v39 = vpop.f32.mrf.mxu0  ;;  %v965_v59 = vadd.f32 %v840_v36, %v6031_v21  ;;  %v707_v51 = vsel %vm623_vm3, %v702_v8, %v706_v57  ;;  %v2133_v49 = vsel %vm2035_vm4, %v2123_v53, %v2132_v22 }
  0xf2   : > { %v1626_v21 = vsel %vm1168_vm2, %v1623_v55, %v1625_v30  ;;  %v708_v55 = vshrl.u32 %v5454_v19, 16 }
  0xf3   : > { %v6166_v12 = vadd.f32 %v2272_v11, %v1831_v46  ;;  %v712_v46 = vshll.u32 %v5455_v50, 16 }
  0xf6   : > { %v1274_v18 = vpop.f32.mrf.mxu2 }
  0xf7   : > { %v1399_v61 = vadd.f32 %v1274_v18, %v965_v59  ;;  %v6171_v24 = vpop.f32.mrf.mxu3 }
  0xf8   : > { %v843_v47 = vpop.f32.mrf.mxu1 }
  0xf9   : > { %v1832_v11 = vadd.f32 %v6124_v9, %v1399_v61  ;;  %v2277_v63 = vpop.f32.mrf.mxu0  ;;  %v966_v36 = vadd.f32 %v843_v47, %v6042_v35  ;;  %v2135_v61 = vshrl.u32 %v5509_v38, 16  ;;  %v2138_v9 = vshll.u32 %v5509_v38, 16 }
  0xfa   : > { %v710_v35 = vor.u32 %v708_v55, %v706_v57  ;;  %v714_v47 = vrot.slane %v712_v46, 1  ;;  %v5510_v55 = vld [vmem:[%s5899_s9 + $0x68] sm:$0xff] }
  0xfb   : > { %4777 = vmatmul.msk.bf16.gmra.mxu1 %vm297_vm1, %v707_v51  ;;  %4868 = vmatmul.msk.bf16.gmra.mxu2 %vm297_vm1, %v1189_v60  ;;  %v6179_v32 = vadd.f32 %v2274_v39, %v1832_v11  ;;  %v2137_v59 = vrot.slane %v2135_v61, 1  ;;  %v2140_v18 = vrot.slane %v2138_v9, 2  ;;  %v5493_v51 = vld [vmem:[%s5899_s9 + $0x70] sm:$0xff]  ;;  %v1190_v11 = vrot.slane %v5473_v2, 1 }
  0xfc   : > { %5050 = vmatmul.msk.bf16.gmra.mxu0 %vm297_vm1, %v2133_v49  ;;  %4961 = vmatmul.msk.bf16.gmra.mxu3 %vm297_vm1, %v1626_v21  ;;  %v1627_v21 = vrot.slane %v5493_v51, 1  ;;  %v2147_v2 = vshll.u32 %v5510_v55, 16  ;;  %v5474_v51 = vld [vmem:[%s5899_s9 + $0x60] sm:$0xff] }
  0xfd   : > { %v2141_v38 = vor.u32 %v2140_v18, %v2137_v59  ;;  %v1191_v61 = vsel %vm1168_vm2, %v1188_v17, %v1190_v11  ;;  %v5456_v17 = vld [vmem:[%s5899_s9 + $0x60] sm:$0xff] }
  0xfe   : > { %v1277_v53 = vpop.f32.mrf.mxu2  ;;  %v720_v18 = vshll.u32 %v5456_v17, 16 }
  0xff   : > { %v1400_v40 = vadd.f32 %v1277_v53, %v966_v36  ;;  %v6186_v14 = vpop.f32.mrf.mxu3  ;;  %v2142_v57 = vsel %vm2035_vm4, %v2132_v22, %v2141_v38 }
 0x100   : > { %v845_v1 = vpop.f32.mrf.mxu1 }
 0x101   : > { %v1833_v39 = vadd.f32 %v6141_v26, %v1400_v40  ;;  %v2279_v8 = vpop.f32.mrf.mxu0  ;;  %v967_v49 = vadd.f32 %v845_v1, %v6059_v48  ;;  %v715_v26 = vsel %vm623_vm3, %v710_v35, %v714_v47  ;;  %v1628_v48 = vsel %vm1168_vm2, %v1625_v30, %v1627_v21 }
 0x102   : > { %v716_v30 = vshrl.u32 %v5455_v50, 16 }
 0x103   : > { %v6190_v60 = vadd.f32 %v2277_v63, %v1833_v39 }
 0x106   : > { %v1279_v19 = vpop.f32.mrf.mxu2 }
 0x107   : > { %v1401_v36 = vadd.f32 %v1279_v19, %v967_v49  ;;  %v6195_v9 = vpop.f32.mrf.mxu3 }
 0x108   : > { %v848_v53 = vpop.f32.mrf.mxu1 }
 0x109   : > { %v1834_v63 = vadd.f32 %v6150_v4, %v1401_v36  ;;  %v2282_v40 = vpop.f32.mrf.mxu0  ;;  %v968_v46 = vadd.f32 %v848_v53, %v6070_v62  ;;  %v2144_v4 = vshrl.u32 %v5510_v55, 16  ;;  %v2149_v36 = vrot.slane %v2147_v2, 2 }
 0x10a   : > { %v718_v62 = vor.u32 %v716_v30, %v714_v47  ;;  %v722_v53 = vrot.slane %v720_v18, 1  ;;  %v5511_v30 = vld [vmem:[%s5899_s9 + $0x70] sm:$0xff] }
 0x10b   : > { %4778 = vmatmul.msk.bf16.gmra.mxu1 %vm297_vm1, %v715_v26  ;;  %4869 = vmatmul.msk.bf16.gmra.mxu2 %vm297_vm1, %v1191_v61  ;;  %v6203_v1 = vadd.f32 %v2279_v8, %v1834_v63  ;;  %v2146_v19 = vrot.slane %v2144_v4, 1  ;;  %v5494_v26 = vld [vmem:[%s5899_s9 + $0x78] sm:$0xff]  ;;  %v1192_v63 = vrot.slane %v5474_v51, 1  ;;  %v2156_v51 = vshll.u32 %v5511_v30, 16 }
 0x10c   : > { %5051 = vmatmul.msk.bf16.gmra.mxu0 %vm297_vm1, %v2142_v57  ;;  %4962 = vmatmul.msk.bf16.gmra.mxu3 %vm297_vm1, %v1628_v48  ;;  %v1629_v48 = vrot.slane %v5494_v26, 1  ;;  %v5475_v26 = vld [vmem:[%s5899_s9 + $0x68] sm:$0xff] }
 0x10d   : > { %v2150_v55 = vor.u32 %v2149_v36, %v2146_v19  ;;  %v1193_v4 = vsel %vm1168_vm2, %v1190_v11, %v1192_v63  ;;  %v5457_v11 = vld [vmem:[%s5899_s9 + $0x68] sm:$0xff] }
 0x10e   : > { %v1282_v22 = vpop.f32.mrf.mxu2  ;;  %v728_v36 = vshll.u32 %v5457_v11, 16 }
 0x10f   : > { %v1402_v39 = vadd.f32 %v1282_v22, %v968_v46  ;;  %v6210_v35 = vpop.f32.mrf.mxu3  ;;  %v2151_v47 = vsel %vm2035_vm4, %v2141_v38, %v2150_v55 }
 0x110   : > { %v850_v59 = vpop.f32.mrf.mxu1 }
 0x111   : > { %v1835_v8 = vadd.f32 %v6162_v41, %v1402_v39  ;;  %v2284_v49 = vpop.f32.mrf.mxu0  ;;  %v969_v57 = vadd.f32 %v850_v59, %v6087_v13  ;;  %v723_v41 = vsel %vm623_vm3, %v718_v62, %v722_v53  ;;  %v1630_v13 = vsel %vm1168_vm2, %v1627_v21, %v1629_v48 }
 0x112   : > { %v724_v21 = vshrl.u32 %v5456_v17, 16 }
 0x113   : > { %v6214_v61 = vadd.f32 %v2282_v40, %v1835_v8 }
 0x116   : > { %v1284_v50 = vpop.f32.mrf.mxu2 }
 0x117   : > { %v1403_v46 = vadd.f32 %v1284_v50, %v969_v57  ;;  %v6219_v2 = vpop.f32.mrf.mxu3 }
 0x118   : > { %v853_v22 = vpop.f32.mrf.mxu1 }
 0x119   : > { %v1836_v40 = vadd.f32 %v6171_v24, %v1403_v46  ;;  %v2287_v39 = vpop.f32.mrf.mxu0  ;;  %v970_v18 = vadd.f32 %v853_v22, %v6098_v33  ;;  %v2153_v24 = vshrl.u32 %v5511_v30, 16  ;;  %v2158_v46 = vrot.slane %v2156_v51, 2 }
 0x11a   : > { %v726_v33 = vor.u32 %v724_v21, %v722_v53  ;;  %v730_v22 = vrot.slane %v728_v36, 1  ;;  %v5512_v21 = vld [vmem:[%s5899_s9 + $0x78] sm:$0xff] }
 0x11b   : > { %4779 = vmatmul.msk.bf16.gmra.mxu1 %vm297_vm1, %v723_v41  ;;  %4870 = vmatmul.msk.bf16.gmra.mxu2 %vm297_vm1, %v1193_v4  ;;  %v6227_v59 = vadd.f32 %v2284_v49, %v1836_v40  ;;  %v2155_v50 = vrot.slane %v2153_v24, 1  ;;  %v5495_v41 = vld [vmem:[%s5899_s9 + $0x80] sm:$0xff]  ;;  %v1194_v40 = vrot.slane %v5475_v26, 1  ;;  %v2165_v26 = vshll.u32 %v5512_v21, 16 }
 0x11c   : > { %5052 = vmatmul.msk.bf16.gmra.mxu0 %vm297_vm1, %v2151_v47  ;;  %4963 = vmatmul.msk.bf16.gmra.mxu3 %vm297_vm1, %v1630_v13  ;;  %v1631_v13 = vrot.slane %v5495_v41, 1  ;;  %v5476_v41 = vld [vmem:[%s5899_s9 + $0x70] sm:$0xff] }
 0x11d   : > { %v2159_v30 = vor.u32 %v2158_v46, %v2155_v50  ;;  %v1195_v24 = vsel %vm1168_vm2, %v1192_v63, %v1194_v40  ;;  %v5458_v63 = vld [vmem:[%s5899_s9 + $0x70] sm:$0xff] }
 0x11e   : > { %v1287_v38 = vpop.f32.mrf.mxu2  ;;  %v736_v46 = vshll.u32 %v5458_v63, 16 }
 0x11f   : > { %v1404_v8 = vadd.f32 %v1287_v38, %v970_v18  ;;  %v6234_v62 = vpop.f32.mrf.mxu3  ;;  %v2160_v53 = vsel %vm2035_vm4, %v2150_v55, %v2159_v30 }
 0x120   : > { %v855_v19 = vpop.f32.mrf.mxu1 }
 0x121   : > { %v1837_v49 = vadd.f32 %v6186_v14, %v1404_v8  ;;  %v2289_v57 = vpop.f32.mrf.mxu0  ;;  %v971_v47 = vadd.f32 %v855_v19, %v6115_v52  ;;  %v731_v14 = vsel %vm623_vm3, %v726_v33, %v730_v22  ;;  %v1632_v52 = vsel %vm1168_vm2, %v1629_v48, %v1631_v13 }
 0x122   : > { %v732_v48 = vshrl.u32 %v5457_v11, 16 }
 0x123   : > { %v6238_v4 = vadd.f32 %v2287_v39, %v1837_v49 }
 0x126   : > { %v1289_v17 = vpop.f32.mrf.mxu2 }
 0x127   : > { %v1405_v18 = vadd.f32 %v1289_v17, %v971_v47  ;;  %v6243_v51 = vpop.f32.mrf.mxu3 }
 0x128   : > { %v858_v38 = vpop.f32.mrf.mxu1 }
 0x129   : > { %v1838_v39 = vadd.f32 %v6195_v9, %v1405_v18  ;;  %v2292_v8 = vpop.f32.mrf.mxu0  ;;  %v972_v36 = vadd.f32 %v858_v38, %v6126_v10  ;;  %v2162_v9 = vshrl.u32 %v5512_v21, 16  ;;  %v2167_v18 = vrot.slane %v2165_v26, 2 }
 0x12a   : > { %v734_v10 = vor.u32 %v732_v48, %v730_v22  ;;  %v738_v38 = vrot.slane %v736_v46, 1  ;;  %v5513_v48 = vld [vmem:[%s5899_s9 + $0x80] sm:$0xff] }
 0x12b   : > { %4780 = vmatmul.msk.bf16.gmra.mxu1 %vm297_vm1, %v731_v14  ;;  %4871 = vmatmul.msk.bf16.gmra.mxu2 %vm297_vm1, %v1195_v24  ;;  %v6251_v19 = vadd.f32 %v2289_v57, %v1838_v39  ;;  %v2164_v17 = vrot.slane %v2162_v9, 1  ;;  %v5496_v14 = vld [vmem:[%s5899_s9 + $0x88] sm:$0xff]  ;;  %v1196_v39 = vrot.slane %v5476_v41, 1  ;;  %v2174_v41 = vshll.u32 %v5513_v48, 16 }
 0x12c   : > { %5053 = vmatmul.msk.bf16.gmra.mxu0 %vm297_vm1, %v2160_v53  ;;  %4964 = vmatmul.msk.bf16.gmra.mxu3 %vm297_vm1, %v1632_v52  ;;  %v1633_v52 = vrot.slane %v5496_v14, 1  ;;  %v5477_v14 = vld [vmem:[%s5899_s9 + $0x78] sm:$0xff] }
 0x12d   : > { %v2168_v21 = vor.u32 %v2167_v18, %v2164_v17  ;;  %v1197_v9 = vsel %vm1168_vm2, %v1194_v40, %v1196_v39  ;;  %v5459_v40 = vld [vmem:[%s5899_s9 + $0x78] sm:$0xff] }
 0x12e   : > { %v1292_v55 = vpop.f32.mrf.mxu2  ;;  %v744_v18 = vshll.u32 %v5459_v40, 16 }
 0x12f   : > { %v1406_v49 = vadd.f32 %v1292_v55, %v972_v36  ;;  %v6258_v33 = vpop.f32.mrf.mxu3  ;;  %v2169_v22 = vsel %vm2035_vm4, %v2159_v30, %v2168_v21 }
 0x130   : > { %v860_v50 = vpop.f32.mrf.mxu1 }
 0x131   : > { %v1839_v57 = vadd.f32 %v6210_v35, %v1406_v49  ;;  %v2294_v47 = vpop.f32.mrf.mxu0  ;;  %v973_v53 = vadd.f32 %v860_v50, %v6143_v37  ;;  %v739_v35 = vsel %vm623_vm3, %v734_v10, %v738_v38  ;;  %v1634_v37 = vsel %vm1168_vm2, %v1631_v13, %v1633_v52 }
 0x132   : > { %v740_v13 = vshrl.u32 %v5458_v63, 16 }
 0x133   : > { %v6262_v24 = vadd.f32 %v2292_v8, %v1839_v57 }
 0x136   : > { %v1294_v11 = vpop.f32.mrf.mxu2 }
 0x137   : > { %v1407_v36 = vadd.f32 %v1294_v11, %v973_v53  ;;  %v6267_v26 = vpop.f32.mrf.mxu3 }
 0x138   : > { %v863_v55 = vpop.f32.mrf.mxu1 }
 0x139   : > { %v1840_v8 = vadd.f32 %v6219_v2, %v1407_v36  ;;  %v2297_v49 = vpop.f32.mrf.mxu0  ;;  %v974_v46 = vadd.f32 %v863_v55, %v6010_v5  ;;  %v2171_v2 = vshrl.u32 %v5513_v48, 16  ;;  %v2176_v36 = vrot.slane %v2174_v41, 2 }
 0x13a   : > { %v742_v5 = vor.u32 %v740_v13, %v738_v38  ;;  %v746_v55 = vrot.slane %v744_v18, 1  ;;  %v5514_v13 = vld [vmem:[%s5899_s9 + $0x88] sm:$0xff] }
 0x13b   : > { %4781 = vmatmul.msk.bf16.gmra.mxu1 %vm297_vm1, %v739_v35  ;;  %4872 = vmatmul.msk.bf16.gmra.mxu2 %vm297_vm1, %v1197_v9  ;;  %v6275_v50 = vadd.f32 %v2294_v47, %v1840_v8  ;;  %v2173_v11 = vrot.slane %v2171_v2, 1  ;;  %v5497_v35 = vld [vmem:[%s5899_s9 + $0x90] sm:$0xff]  ;;  %v1198_v8 = vrot.slane %v5477_v14, 1  ;;  %v2183_v14 = vshll.u32 %v5514_v13, 16 }
 0x13c   : > { %5054 = vmatmul.msk.bf16.gmra.mxu0 %vm297_vm1, %v2169_v22  ;;  %4965 = vmatmul.msk.bf16.gmra.mxu3 %vm297_vm1, %v1634_v37  ;;  %v1635_v37 = vrot.slane %v5497_v35, 1  ;;  %v748_v35 = vshrl.u32 %v5459_v40, 16 }
 0x13d   : > { %6975 = vst [vmem:[#allocation10_spill] sm:$0xff] %v6275_v50  ;;  %v2177_v48 = vor.u32 %v2176_v36, %v2173_v11  ;;  %v1199_v2 = vsel %vm1168_vm2, %v1196_v39, %v1198_v8  ;;  %v6303_v39 = vld [vmem:[%s5899_s9 + $0x80] sm:$0xff] }
 0x13e   : > { %v1297_v30 = vpop.f32.mrf.mxu2 }
 0x13f   : > { %v1408_v57 = vadd.f32 %v1297_v30, %v974_v46  ;;  %v6282_v10 = vpop.f32.mrf.mxu3 }
 0x140   : > { %v865_v17 = vpop.f32.mrf.mxu1 }
 0x141   : > { %v1841_v47 = vadd.f32 %v6234_v62, %v1408_v57  ;;  %v2299_v53 = vpop.f32.mrf.mxu0  ;;  %v975_v22 = vadd.f32 %v865_v17, %v6026_v16  ;;  %v747_v62 = vsel %vm623_vm3, %v742_v5, %v746_v55  ;;  %v2178_v57 = vsel %vm2035_vm4, %v2168_v21, %v2177_v48  ;;  %v1506_v21 = vld [vmem:[%s5899_s9 + $0x98] sm:$0x1] }
 0x142   : > { %v1636_v16 = vsel %vm1168_vm2, %v1633_v52, %v1635_v37  ;;  %v1582_v52 = vunpack.c.l.b16 %v1506_v21  ;;  %v752_v5 = vshll.u32 %v6303_v39, 16 }
 0x143   : > { %v6286_v9 = vadd.f32 %v2297_v49, %v1841_v47 }
 0x145   : > { %6976 = vst [vmem:[#allocation11_spill] sm:$0xff] %v6286_v9  ;;  %v527_v9 = vld [vmem:[%s5899_s9 + $0x90] sm:$0x1] }
 0x146   : > { %v1299_v63 = vpop.f32.mrf.mxu2 }
 0x147   : > { %v1409_v46 = vadd.f32 %v1299_v63, %v975_v22  ;;  %v6291_v41 = vpop.f32.mrf.mxu3 }
 0x148   : > { %v868_v30 = vpop.f32.mrf.mxu1 }
 0x149   : > { %v1842_v49 = vadd.f32 %v6243_v51, %v1409_v46  ;;  %v2302_v38 = vpop.f32.mrf.mxu0  ;;  %v976_v18 = vadd.f32 %v868_v30, %v6036_v31  ;;  %v2180_v51 = vshrl.u32 %v5514_v13, 16  ;;  %v2185_v30 = vrot.slane %v2183_v14, 2 }
 0x14b   : > { %4782 = vmatmul.msk.bf16.gmra.mxu1 %vm297_vm1, %v747_v62  ;;  %4873 = vmatmul.msk.bf16.gmra.mxu2 %vm297_vm1, %v1199_v2  ;;  %v6299_v17 = vadd.f32 %v2299_v53, %v1842_v49  ;;  %v6310_v53 = vld [vmem:[%s5899_s9 + $0x80] sm:$0xff]  ;;  %v2182_v31 = vrot.slane %v2180_v51, 1  ;;  %v1601_v62 = vpack.c.b16 %v1582_v52, %v1582_v52  ;;  %v750_v49 = vor.u32 %v748_v35, %v746_v55  ;;  %v5244_v35 = vld [vmem:[%s5899_s9 + $0x10] sm:$0xc] }
 0x14c   : > { %5055 = vmatmul.msk.bf16.gmra.mxu0 %vm297_vm1, %v2178_v57  ;;  %4966 = vmatmul.msk.bf16.gmra.mxu3 %vm297_vm1, %v1636_v16  ;;  %v754_v57 = vrot.slane %v752_v5, 1  ;;  %v6968_v13 = vrot.slane %v6310_v53, 1  ;;  %v5552_v5 = vld [vmem:[%s5899_s9 + $0x10] sm:$0xf0] }
 0x14d   : > { %6977 = vst [vmem:[#allocation12_spill] sm:$0xff] %v6299_v17  ;;  %v6319_v16 = vor.u32 %v2185_v30, %v2182_v31  ;;  %v1637_v21 = vrot.slane %v1601_v62, 1  ;;  %v5245_v31 = vor.u32 %v5552_v5, %v5244_v35  ;;  %v1939_v35 = vld [vmem:[%s5899_s9 + $0x98] sm:$0x3] }
 0x14e   : > { %v1302_v47 = vpop.f32.mrf.mxu2  ;;  %v1201_v55 = vsel %vm1168_vm2, %v1198_v8, %v6968_v13  ;;  %v6340_v8 = vld [vmem:[%s5899_s9 + $0x88] sm:$0xff] }
 0x14f   : > { %v1410_v11 = vadd.f32 %v1302_v47, %v976_v18  ;;  %v6312_v22 = vpop.f32.mrf.mxu3  ;;  %v2187_v52 = vsel %vm2035_vm4, %v2177_v48, %v6319_v16 }
 0x150   : > { %v870_v36 = vpop.f32.mrf.mxu1 }
 0x151   : > { %v1843_v63 = vadd.f32 %v6258_v33, %v1410_v11  ;;  %v2304_v46 = vpop.f32.mrf.mxu0  ;;  %v977_v40 = vadd.f32 %v870_v36, %v6054_v43  ;;  %v5515_v11 = vld [vmem:[%s5899_s9 + $0x90] sm:$0xff]  ;;  %v1638_v36 = vsel %vm1168_vm2, %v1635_v37, %v1637_v21 }
 0x152   : > { %v2189_v30 = vshrl.u32 %v5515_v11, 16  ;;  %v2192_v62 = vshll.u32 %v5515_v11, 16 }
 0x153   : > { %v6315_v2 = vadd.f32 %v2302_v38, %v1843_v63  ;;  %v755_v38 = vsel %vm623_vm3, %v750_v49, %v754_v57  ;;  %v3471_v49 = vshrl.u32 %v5245_v31, 16 }
 0x154   : > { %v2191_v11 = vrot.slane %v2189_v30, 1 }
 0x155   : > { %6978 = vst [vmem:[#allocation13_spill] sm:$0xff] %v6315_v2  ;;  %v3473_v5 = vrot.slane %v3471_v49, 2 }
 0x156   : > { %v1304_v18 = vpop.f32.mrf.mxu2 }
 0x157   : > { %v1411_v33 = vadd.f32 %v1304_v18, %v977_v40  ;;  %v6325_v14 = vpop.f32.mrf.mxu3  ;;  %v3474_v40 = vshll.u32 %v5245_v31, 16 }
 0x158   : > { %v873_v51 = vpop.f32.mrf.mxu1 }
 0x159   : > { %v1844_v43 = vadd.f32 %v6267_v26, %v1411_v33  ;;  %v2307_v47 = vpop.f32.mrf.mxu0  ;;  %v5553_v26 = vld [vmem:[%s5899_s9 + $0x18] sm:$0xff]  ;;  %v978_v48 = vadd.f32 %v873_v51, %v6064_v58  ;;  %v3476_v31 = vrot.slane %v3474_v40, 3 }
 0x15a   : > { %v3479_v18 = vshrl.u32 %v5553_v26, 16 }
 0x15b   : > { %4783 = vmatmul.msk.bf16.gmra.mxu1 %vm297_vm1, %v755_v38  ;;  %4874 = vmatmul.msk.bf16.gmra.mxu2 %vm297_vm1, %v1201_v55  ;;  %v6336_v63 = vadd.f32 %v2304_v46, %v1844_v43  ;;  %v3482_v46 = vshll.u32 %v5553_v26, 16  ;;  %v756_v38 = vshrl.u32 %v6303_v39, 16  ;;  %v760_v55 = vshll.u32 %v6340_v8, 16  ;;  %v6348_v43 = vld [vmem:[%s5899_s9 + $0x88] sm:$0xff] }
 0x15c   : > { %5056 = vmatmul.msk.bf16.gmra.mxu0 %vm297_vm1, %v2187_v52  ;;  %4967 = vmatmul.msk.bf16.gmra.mxu3 %vm297_vm1, %v1638_v36  ;;  %v2194_v36 = vrot.slane %v2192_v62, 2  ;;  %v3481_v26 = vrot.slane %v3479_v18, 2  ;;  %v3477_v30 = vor.u32 %v3476_v31, %v3473_v5  ;;  %v603_v18 = vunpack.c.l.b16 %v527_v9 }
 0x15d   : > { %6979 = vst [vmem:[#allocation14_spill] sm:$0xff] %v6336_v63  ;;  %v758_v39 = vor.u32 %v756_v38, %v754_v57  ;;  %v762_v13 = vrot.slane %v760_v55, 1  ;;  %v1202_v63 = vrot.slane %v6348_v43, 1  ;;  %v1072_v55 = vld [vmem:[%s5899_s9 + $0x90] sm:$0x1] }
 0x15e   : > { %v1307_v37 = vpop.f32.mrf.mxu2  ;;  %v2195_v17 = vor.u32 %v2194_v36, %v2191_v11  ;;  %v622_v9 = vpack.c.b16 %v603_v18, %v603_v18  ;;  %v5554_v11 = vld [vmem:[%s5899_s9 + $0x20] sm:$0xff] }
 0x15f   : > { %v1412_v21 = vadd.f32 %v1307_v37, %v978_v48  ;;  %v6350_v52 = vpop.f32.mrf.mxu3  ;;  %v3484_v48 = vrot.slane %v3482_v46, 3  ;;  %v763_v40 = vsel %vm623_vm3, %v758_v39, %v762_v13  ;;  %v3491_v5 = vshll.u32 %v5554_v11, 16 }
 0x160   : > { %v875_v33 = vpop.f32.mrf.mxu1  ;;  %v2196_v38 = vsel %vm2035_vm4, %v6319_v16, %v2195_v17 }
 0x161   : > { %v1845_v58 = vadd.f32 %v6282_v10, %v1412_v21  ;;  %v2309_v51 = vpop.f32.mrf.mxu0  ;;  %v979_v2 = vadd.f32 %v875_v33, %v6082_v7  ;;  %v2015_v10 = vunpack.c.l.b16 %v1939_v35  ;;  %v3485_v62 = vor.u32 %v3484_v48, %v3481_v26 }
 0x162   : > { %v3488_v35 = vshrl.u32 %v5554_v11, 16  ;;  %v764_v48 = vshrl.u32 %v6340_v8, 16 }
 0x163   : > { %v6354_v37 = vadd.f32 %v2307_v47, %v1845_v58  ;;  %v6980_v47 = vrot.slane %v6310_v53, 1  ;;  %v3486_v43 = vsel %vm3469_vm5, %v3477_v30, %v3485_v62  ;;  %v1148_v58 = vunpack.c.l.b16 %v1072_v55 }
 0x164   : > { %v766_v18 = vor.u32 %v764_v48, %v762_v13 }
 0x165   : > { %v1203_v57 = vsel %vm1168_vm2, %v6980_v47, %v1202_v63  ;;  %v1167_v39 = vpack.c.b16 %v1148_v58, %v1148_v58  ;;  %v3493_v47 = vrot.slane %v3491_v5, 3  ;;  %v5153_v5 = vld [vmem:[%s5899_s9 + $0x10] sm:$0xc] }
 0x166   : > { %v1309_v21 = vpop.f32.mrf.mxu2 }
 0x167   : > { %v1413_v50 = vadd.f32 %v1309_v21, %v979_v2  ;;  %v6363_v46 = vpop.f32.mrf.mxu3  ;;  %v2034_v2 = vpack.c.b16 %v2015_v10, %v2015_v10 }
 0x168   : > { %v878_v49 = vpop.f32.mrf.mxu1 }
 0x169   : > { %v1846_v7 = vadd.f32 %v6291_v41, %v1413_v50  ;;  %v2312_v33 = vpop.f32.mrf.mxu0  ;;  %v980_v50 = vadd.f32 %v878_v49, %v6092_v27  ;;  %v2198_v41 = vshrl.u32 %v2034_v2, 16  ;;  %v2201_v36 = vshll.u32 %v2034_v2, 16 }
 0x16a   : > { %v3490_v49 = vrot.slane %v3488_v35, 2  ;;  %v5516_v35 = vld [vmem:[%s5899_s9 + $0x8] sm:$0xf0] }
 0x16b   : > { %4784 = vmatmul.msk.bf16.gmra.mxu1 %vm297_vm1, %v763_v40  ;;  %4875 = vmatmul.msk.bf16.gmra.mxu2 %vm297_vm1, %v1203_v57  ;;  %v6372_v53 = vadd.f32 %v2309_v51, %v1846_v7  ;;  %v768_v51 = vshll.u32 %v622_v9, 16  ;;  %v2200_v40 = vrot.slane %v2198_v41, 1  ;;  %v2203_v27 = vrot.slane %v2201_v36, 2 }
 0x16c   : > { %5057 = vmatmul.msk.bf16.gmra.mxu0 %vm297_vm1, %v2196_v38  ;;  %5314 = vmatmul.msk.bf16.vlgmr.msra.gmra.mxu3 %vm297_vm1, %v3486_v43  ;;  %v1204_v38 = vrot.slane %v1167_v39, 1  ;;  %v3494_v43 = vor.u32 %v3493_v47, %v3490_v49 }
 0x16d   : > { %v770_v7 = vrot.slane %v768_v51, 1  ;;  %v2204_v2 = vor.u32 %v2203_v27, %v2200_v40  ;;  %v5535_v27 = vld [vmem:[%s5899_s9 + $0x18] sm:$0xff] }
 0x16e   : > { %v1312_v16 = vpop.f32.mrf.mxu2  ;;  %v3495_v41 = vsel %vm3469_vm5, %v3485_v62, %v3494_v43  ;;  %v5335_v62 = vld [vmem:[%s5899_s9 + $0x10] sm:$0x8] }
 0x16f   : > { %v1414_v31 = vadd.f32 %v1312_v16, %v980_v50  ;;  %v6379_v10 = vpop.f32.mrf.mxu3  ;;  %v771_v58 = vsel %vm623_vm3, %v766_v18, %v770_v7  ;;  %v2205_v50 = vsel %vm2035_vm4, %v2195_v17, %v2204_v2  ;;  %v5555_v16 = vld [vmem:[%s5899_s9 + $0x28] sm:$0xff]  ;;  %v5571_v7 = vld [vmem:[%s5899_s9 + $0x18] sm:$0xff] }
 0x170   : > { %v880_v26 = vpop.f32.mrf.mxu1  ;;  %v3497_v48 = vshrl.u32 %v5555_v16, 16  ;;  %v3500_v51 = vshll.u32 %v5555_v16, 16 }
 0x171   : > { %v1847_v21 = vadd.f32 %v6312_v22, %v1414_v31  ;;  %v2314_v30 = vpop.f32.mrf.mxu0  ;;  %v981_v55 = vadd.f32 %v880_v26, %v6110_v45  ;;  %v5534_v31 = vld [vmem:[%s5899_s9 + $0x10] sm:$0xf0] }
 0x172   : > { %v5570_v26 = vld [vmem:[%s5899_s9 + $0x10] sm:$0xf0]  ;;  %v5154_v49 = vor.u32 %v5534_v31, %v5153_v5  ;;  %v3502_v2 = vrot.slane %v3500_v51, 3 }
 0x173   : > { %v6382_v57 = vadd.f32 %v2312_v33, %v1847_v21  ;;  %v1205_v33 = vsel %vm1168_vm2, %v1202_v63, %v1204_v38  ;;  %v5062_v63 = vld [vmem:[%s5899_s9 + $0x8] sm:$0xc]  ;;  %v5336_v38 = vor.u32 %v5570_v26, %v5335_v62 }
 0x174   : > { %v5063_v40 = vor.u32 %v5516_v35, %v5062_v63 }
 0x176   : > { %v1314_v8 = vpop.f32.mrf.mxu2 }
 0x177   : > { %v1415_v9 = vadd.f32 %v1314_v8, %v981_v55  ;;  %v6387_v11 = vpop.f32.mrf.mxu3  ;;  %v3499_v55 = vrot.slane %v3497_v48, 2  ;;  %v5556_v48 = vld [vmem:[%s5899_s9 + $0x30] sm:$0xff] }
 0x178   : > { %v883_v22 = vpop.f32.mrf.mxu1 }
 0x179   : > { %v1848_v13 = vadd.f32 %v6325_v14, %v1415_v9  ;;  %v2317_v45 = vpop.f32.mrf.mxu0  ;;  %v982_v14 = vadd.f32 %v883_v22, %v6120_v3  ;;  %v2603_v9 = vrot.slane %v5063_v40, 2 }
 0x17b   : > { %4785 = vmatmul.msk.bf16.gmra.mxu1 %vm297_vm1, %v771_v58  ;;  %4876 = vmatmul.msk.bf16.gmra.mxu2 %vm297_vm1, %v1205_v33  ;;  %v6394_v36 = vadd.f32 %v2314_v30, %v1848_v13  ;;  %v6407_v30 = vld [vmem:[%s5899_s9 + $0x10] sm:$0xff]  ;;  %v3036_v58 = vrot.slane %v5154_v49, 2  ;;  %v3037_v33 = vrot.slane %v5535_v27, 2  ;;  %v5536_v27 = vld [vmem:[%s5899_s9 + $0x20] sm:$0xff] }
 0x17c   : > { %5058 = vmatmul.msk.bf16.gmra.mxu0 %vm297_vm1, %v2205_v50  ;;  %5315 = vmatmul.msk.bf16.gmra.mxu3 %vm297_vm1, %v3495_v41  ;;  %v2604_v22 = vrot.slane %v6407_v30, 2  ;;  %v4037_v50 = vrot.slane %v5336_v38, 3  ;;  %v4038_v41 = vrot.slane %v5571_v7, 3  ;;  %v5572_v7 = vld [vmem:[%s5899_s9 + $0x20] sm:$0xff] }
 0x17e   : > { %v1317_v17 = vpop.f32.mrf.mxu2  ;;  %v2605_v35 = vsel %vm2602_vm6, %v2603_v9, %v2604_v22  ;;  %v3039_v9 = vrot.slane %v5536_v27, 2 }
 0x17f   : > { %v1416_v39 = vadd.f32 %v1317_v17, %v982_v14  ;;  %v6410_v47 = vpop.f32.mrf.mxu3 }
 0x180   : > { %v885_v21 = vpop.f32.mrf.mxu1 }
 0x181   : > { %v1849_v3 = vadd.f32 %v6350_v52, %v1416_v39  ;;  %v2319_v18 = vpop.f32.mrf.mxu0  ;;  %v983_v13 = vadd.f32 %v885_v21, %v6138_v28  ;;  %v3503_v52 = vor.u32 %v3502_v2, %v3499_v55  ;;  %v4039_v28 = vsel %vm4036_vm7, %v4037_v50, %v4038_v41 }
 0x182   : > { %v3506_v39 = vshrl.u32 %v5556_v48, 16  ;;  %v3509_v21 = vshll.u32 %v5556_v48, 16 }
 0x183   : > { %v6414_v8 = vadd.f32 %v2317_v45, %v1849_v3  ;;  %v3038_v45 = vsel %vm2602_vm6, %v3036_v58, %v3037_v33  ;;  %v3504_v62 = vsel %vm3469_vm5, %v3494_v43, %v3503_v52  ;;  %v5518_v43 = vld [vmem:[%s5899_s9 + $0x18] sm:$0xff] }
 0x184   : > { %v3508_v38 = vrot.slane %v3506_v39, 2  ;;  %v3511_v55 = vrot.slane %v3509_v21, 3  ;;  %v5537_v39 = vld [vmem:[%s5899_s9 + $0x28] sm:$0xff] }
 0x186   : > { %v1319_v63 = vpop.f32.mrf.mxu2 }
 0x187   : > { %v1417_v16 = vadd.f32 %v1319_v63, %v983_v13  ;;  %v6420_v5 = vpop.f32.mrf.mxu3  ;;  %v4040_v13 = vrot.slane %v5572_v7, 3  ;;  %v3512_v63 = vor.u32 %v3511_v55, %v3508_v38  ;;  %v3041_v7 = vrot.slane %v5537_v39, 2 }
 0x188   : > { %v888_v14 = vpop.f32.mrf.mxu1 }
 0x189   : > { %v1850_v31 = vadd.f32 %v6363_v46, %v1417_v16  ;;  %v2322_v17 = vpop.f32.mrf.mxu0  ;;  %v984_v51 = vadd.f32 %v888_v14, %v6024_v15  ;;  %v2606_v15 = vrot.slane %v5518_v43, 2  ;;  %v5573_v43 = vld [vmem:[%s5899_s9 + $0x28] sm:$0xff] }
 0x18a   : > { %v4042_v55 = vrot.slane %v5573_v43, 3 }
 0x18b   : > { %5132 = vmatmul.msk.bf16.vlgmr.msra.gmra.mxu1 %vm297_vm1, %v2605_v35  ;;  %5223 = vmatmul.msk.bf16.vlgmr.msra.gmra.mxu2 %vm297_vm1, %v3038_v45  ;;  %v6427_v26 = vadd.f32 %v2319_v18, %v1850_v31  ;;  %v2607_v35 = vsel %vm2602_vm6, %v2604_v22, %v2606_v15  ;;  %v5557_v22 = vld [vmem:[%s5899_s9 + $0x38] sm:$0xff] }
 0x18c   : > { %5405 = vmatmul.msk.bf16.vlgmr.msra.gmra.mxu0 %vm297_vm1, %v4039_v28  ;;  %5316 = vmatmul.msk.bf16.gmra.mxu3 %vm297_vm1, %v3504_v62  ;;  %v4041_v28 = vsel %vm4036_vm7, %v4038_v41, %v4040_v13  ;;  %v3515_v48 = vshrl.u32 %v5557_v22, 16 }
 0x18e   : > { %v1322_v46 = vpop.f32.mrf.mxu2  ;;  %v3517_v27 = vrot.slane %v3515_v48, 2  ;;  %v5538_v48 = vld [vmem:[%s5899_s9 + $0x30] sm:$0xff] }
 0x18f   : > { %v1418_v30 = vadd.f32 %v1322_v46, %v984_v51  ;;  %v6435_v49 = vpop.f32.mrf.mxu3  ;;  %v3518_v51 = vshll.u32 %v5557_v22, 16  ;;  %v3043_v43 = vrot.slane %v5538_v48, 2 }
 0x190   : > { %v890_v40 = vpop.f32.mrf.mxu1 }
 0x191   : > { %v1851_v3 = vadd.f32 %v6379_v10, %v1418_v30  ;;  %v2324_v18 = vpop.f32.mrf.mxu0  ;;  %v985_v58 = vadd.f32 %v890_v40, %v6034_v29  ;;  %v3040_v10 = vsel %vm2602_vm6, %v3037_v33, %v3039_v9  ;;  %v3513_v29 = vsel %vm3469_vm5, %v3503_v52, %v3512_v63  ;;  %v5519_v52 = vld [vmem:[%s5899_s9 + $0x20] sm:$0xff] }
 0x193   : > { %v6439_v2 = vadd.f32 %v2322_v17, %v1851_v3  ;;  %v3520_v3 = vrot.slane %v3518_v51, 3 }
 0x196   : > { %v1324_v50 = vpop.f32.mrf.mxu2 }
 0x197   : > { %v1419_v16 = vadd.f32 %v1324_v50, %v985_v58  ;;  %v6444_v45 = vpop.f32.mrf.mxu3  ;;  %v3521_v50 = vor.u32 %v3520_v3, %v3517_v27 }
 0x198   : > { %v893_v14 = vpop.f32.mrf.mxu1 }
 0x199   : > { %v1852_v31 = vadd.f32 %v6387_v11, %v1419_v16  ;;  %v2327_v17 = vpop.f32.mrf.mxu0  ;;  %v986_v33 = vadd.f32 %v893_v14, %v6052_v42  ;;  %v2608_v42 = vrot.slane %v5519_v52, 2  ;;  %v5574_v52 = vld [vmem:[%s5899_s9 + $0x30] sm:$0xff] }
 0x19a   : > { %v4044_v3 = vrot.slane %v5574_v52, 3 }
 0x19b   : > { %5133 = vmatmul.msk.bf16.gmra.mxu1 %vm297_vm1, %v2607_v35  ;;  %5224 = vmatmul.msk.bf16.gmra.mxu2 %vm297_vm1, %v3040_v10  ;;  %v6451_v62 = vadd.f32 %v2324_v18, %v1852_v31  ;;  %v2609_v35 = vsel %vm2602_vm6, %v2606_v15, %v2608_v42  ;;  %v5558_v15 = vld [vmem:[%s5899_s9 + $0x40] sm:$0xff] }
 0x19c   : > { %5406 = vmatmul.msk.bf16.gmra.mxu0 %vm297_vm1, %v4041_v28  ;;  %5317 = vmatmul.msk.bf16.gmra.mxu3 %vm297_vm1, %v3513_v29  ;;  %v4043_v28 = vsel %vm4036_vm7, %v4040_v13, %v4042_v55  ;;  %v3524_v22 = vshrl.u32 %v5558_v15, 16 }
 0x19e   : > { %v1327_v11 = vpop.f32.mrf.mxu2  ;;  %v3526_v39 = vrot.slane %v3524_v22, 2  ;;  %v5539_v22 = vld [vmem:[%s5899_s9 + $0x38] sm:$0xff] }
 0x19f   : > { %v1420_v41 = vadd.f32 %v1327_v11, %v986_v33  ;;  %v6459_v21 = vpop.f32.mrf.mxu3  ;;  %v3527_v33 = vshll.u32 %v5558_v15, 16  ;;  %v3045_v52 = vrot.slane %v5539_v22, 2 }
 0x1a0   : > { %v895_v46 = vpop.f32.mrf.mxu1 }
 0x1a1   : > { %v1853_v30 = vadd.f32 %v6410_v47, %v1420_v41  ;;  %v2329_v40 = vpop.f32.mrf.mxu0  ;;  %v987_v38 = vadd.f32 %v895_v46, %v6062_v56  ;;  %v3042_v47 = vsel %vm2602_vm6, %v3039_v9, %v3041_v7  ;;  %v3522_v56 = vsel %vm3469_vm5, %v3512_v63, %v3521_v50  ;;  %v5520_v63 = vld [vmem:[%s5899_s9 + $0x28] sm:$0xff] }
 0x1a3   : > { %v6463_v18 = vadd.f32 %v2327_v17, %v1853_v30  ;;  %v3529_v30 = vrot.slane %v3527_v33, 3 }
 0x1a6   : > { %v1329_v58 = vpop.f32.mrf.mxu2 }
 0x1a7   : > { %v1421_v16 = vadd.f32 %v1329_v58, %v987_v38  ;;  %v6468_v10 = vpop.f32.mrf.mxu3  ;;  %v3530_v58 = vor.u32 %v3529_v30, %v3526_v39 }
 0x1a8   : > { %v898_v14 = vpop.f32.mrf.mxu1 }
 0x1a9   : > { %v1854_v31 = vadd.f32 %v6420_v5, %v1421_v16  ;;  %v2332_v17 = vpop.f32.mrf.mxu0  ;;  %v988_v9 = vadd.f32 %v898_v14, %v6080_v6  ;;  %v2610_v6 = vrot.slane %v5520_v63, 2  ;;  %v5575_v63 = vld [vmem:[%s5899_s9 + $0x38] sm:$0xff] }
 0x1aa   : > { %v4046_v30 = vrot.slane %v5575_v63, 3 }
 0x1ab   : > { %5134 = vmatmul.msk.bf16.gmra.mxu1 %vm297_vm1, %v2609_v35  ;;  %5225 = vmatmul.msk.bf16.gmra.mxu2 %vm297_vm1, %v3042_v47  ;;  %v6475_v29 = vadd.f32 %v2329_v40, %v1854_v31  ;;  %v2611_v35 = vsel %vm2602_vm6, %v2608_v42, %v2610_v6  ;;  %v5559_v42 = vld [vmem:[%s5899_s9 + $0x48] sm:$0xff] }
 0x1ac   : > { %5407 = vmatmul.msk.bf16.gmra.mxu0 %vm297_vm1, %v4043_v28  ;;  %5318 = vmatmul.msk.bf16.gmra.mxu3 %vm297_vm1, %v3522_v56  ;;  %v4045_v28 = vsel %vm4036_vm7, %v4042_v55, %v4044_v3  ;;  %v3533_v15 = vshrl.u32 %v5559_v42, 16 }
 0x1ae   : > { %v1332_v5 = vpop.f32.mrf.mxu2  ;;  %v3535_v48 = vrot.slane %v3533_v15, 2  ;;  %v5540_v15 = vld [vmem:[%s5899_s9 + $0x40] sm:$0xff] }
 0x1af   : > { %v1422_v13 = vadd.f32 %v1332_v5, %v988_v9  ;;  %v6483_v51 = vpop.f32.mrf.mxu3  ;;  %v3536_v9 = vshll.u32 %v5559_v42, 16  ;;  %v3047_v63 = vrot.slane %v5540_v15, 2 }
 0x1b0   : > { %v900_v11 = vpop.f32.mrf.mxu1 }
 0x1b1   : > { %v1855_v41 = vadd.f32 %v6435_v49, %v1422_v13  ;;  %v2334_v46 = vpop.f32.mrf.mxu0  ;;  %v989_v27 = vadd.f32 %v900_v11, %v6090_v25  ;;  %v3044_v49 = vsel %vm2602_vm6, %v3041_v7, %v3043_v43  ;;  %v3531_v25 = vsel %vm3469_vm5, %v3521_v50, %v3530_v58  ;;  %v5521_v50 = vld [vmem:[%s5899_s9 + $0x30] sm:$0xff] }
 0x1b3   : > { %v6487_v40 = vadd.f32 %v2332_v17, %v1855_v41  ;;  %v3538_v41 = vrot.slane %v3536_v9, 3 }
 0x1b6   : > { %v1334_v38 = vpop.f32.mrf.mxu2 }
 0x1b7   : > { %v1423_v16 = vadd.f32 %v1334_v38, %v989_v27  ;;  %v6492_v47 = vpop.f32.mrf.mxu3  ;;  %v3539_v38 = vor.u32 %v3538_v41, %v3535_v48 }
 0x1b8   : > { %v903_v14 = vpop.f32.mrf.mxu1 }
 0x1b9   : > { %v1856_v31 = vadd.f32 %v6444_v45, %v1423_v16  ;;  %v2337_v17 = vpop.f32.mrf.mxu0  ;;  %v990_v7 = vadd.f32 %v903_v14, %v6108_v44  ;;  %v2612_v44 = vrot.slane %v5521_v50, 2  ;;  %v5576_v50 = vld [vmem:[%s5899_s9 + $0x40] sm:$0xff] }
 0x1ba   : > { %v4048_v41 = vrot.slane %v5576_v50, 3 }
 0x1bb   : > { %5135 = vmatmul.msk.bf16.gmra.mxu1 %vm297_vm1, %v2611_v35  ;;  %5226 = vmatmul.msk.bf16.gmra.mxu2 %vm297_vm1, %v3044_v49  ;;  %v6499_v56 = vadd.f32 %v2334_v46, %v1856_v31  ;;  %v2613_v35 = vsel %vm2602_vm6, %v2610_v6, %v2612_v44  ;;  %v5560_v6 = vld [vmem:[%s5899_s9 + $0x50] sm:$0xff] }
 0x1bc   : > { %5408 = vmatmul.msk.bf16.gmra.mxu0 %vm297_vm1, %v4045_v28  ;;  %5319 = vmatmul.msk.bf16.gmra.mxu3 %vm297_vm1, %v3531_v25  ;;  %v4047_v28 = vsel %vm4036_vm7, %v4044_v3, %v4046_v30  ;;  %v3542_v42 = vshrl.u32 %v5560_v6, 16 }
 0x1be   : > { %v1337_v45 = vpop.f32.mrf.mxu2  ;;  %v3544_v22 = vrot.slane %v3542_v42, 2  ;;  %v5541_v42 = vld [vmem:[%s5899_s9 + $0x48] sm:$0xff] }
 0x1bf   : > { %v1424_v55 = vadd.f32 %v1337_v45, %v990_v7  ;;  %v6507_v33 = vpop.f32.mrf.mxu3  ;;  %v3545_v7 = vshll.u32 %v5560_v6, 16  ;;  %v3049_v50 = vrot.slane %v5541_v42, 2  ;;  %v5578_v42 = vld [vmem:[%s5899_s9 + $0x50] sm:$0xff] }
 0x1c0   : > { %v905_v5 = vpop.f32.mrf.mxu1 }
 0x1c1   : > { %v1857_v13 = vadd.f32 %v6459_v21, %v1424_v55  ;;  %v2339_v11 = vpop.f32.mrf.mxu0  ;;  %v991_v39 = vadd.f32 %v905_v5, %v6118_v0  ;;  %v3046_v21 = vsel %vm2602_vm6, %v3043_v43, %v3045_v52  ;;  %v3540_v0 = vsel %vm3469_vm5, %v3530_v58, %v3539_v38  ;;  %v5522_v58 = vld [vmem:[%s5899_s9 + $0x38] sm:$0xff] }
 0x1c3   : > { %v6511_v46 = vadd.f32 %v2337_v17, %v1857_v13  ;;  %v3547_v13 = vrot.slane %v3545_v7, 3 }
 0x1c6   : > { %v1339_v27 = vpop.f32.mrf.mxu2 }
 0x1c7   : > { %v1425_v16 = vadd.f32 %v1339_v27, %v991_v39  ;;  %v6516_v49 = vpop.f32.mrf.mxu3  ;;  %v3548_v27 = vor.u32 %v3547_v13, %v3544_v22 }
 0x1c8   : > { %v908_v14 = vpop.f32.mrf.mxu1 }
 0x1c9   : > { %v1858_v31 = vadd.f32 %v6468_v10, %v1425_v16  ;;  %v2342_v17 = vpop.f32.mrf.mxu0  ;;  %v992_v43 = vadd.f32 %v908_v14, %v6136_v23  ;;  %v2614_v23 = vrot.slane %v5522_v58, 2  ;;  %v5577_v58 = vld [vmem:[%s5899_s9 + $0x48] sm:$0xff] }
 0x1ca   : > { %v4050_v13 = vrot.slane %v5577_v58, 3 }
 0x1cb   : > { %5136 = vmatmul.msk.bf16.gmra.mxu1 %vm297_vm1, %v2613_v35  ;;  %5227 = vmatmul.msk.bf16.gmra.mxu2 %vm297_vm1, %v3046_v21  ;;  %v6523_v25 = vadd.f32 %v2339_v11, %v1858_v31  ;;  %v2615_v35 = vsel %vm2602_vm6, %v2612_v44, %v2614_v23  ;;  %v5561_v44 = vld [vmem:[%s5899_s9 + $0x58] sm:$0xff] }
 0x1cc   : > { %5409 = vmatmul.msk.bf16.gmra.mxu0 %vm297_vm1, %v4047_v28  ;;  %5320 = vmatmul.msk.bf16.gmra.mxu3 %vm297_vm1, %v3540_v0  ;;  %v4049_v28 = vsel %vm4036_vm7, %v4046_v30, %v4048_v41  ;;  %v3551_v6 = vshrl.u32 %v5561_v44, 16 }
 0x1ce   : > { %v1342_v10 = vpop.f32.mrf.mxu2  ;;  %v3553_v15 = vrot.slane %v3551_v6, 2 }
 0x1cf   : > { %v1426_v3 = vadd.f32 %v1342_v10, %v992_v43  ;;  %v6531_v9 = vpop.f32.mrf.mxu3  ;;  %v3554_v43 = vshll.u32 %v5561_v44, 16 }
 0x1d0   : > { %v910_v45 = vpop.f32.mrf.mxu1 }
 0x1d1   : > { %v1859_v55 = vadd.f32 %v6483_v51, %v1426_v3  ;;  %v2344_v5 = vpop.f32.mrf.mxu0  ;;  %v993_v48 = vadd.f32 %v910_v45, %v6146_v54  ;;  %v3048_v51 = vsel %vm2602_vm6, %v3045_v52, %v3047_v63  ;;  %v3549_v54 = vsel %vm3469_vm5, %v3539_v38, %v3548_v27  ;;  %v5523_v38 = vld [vmem:[%s5899_s9 + $0x40] sm:$0xff] }
 0x1d3   : > { %v6535_v11 = vadd.f32 %v2342_v17, %v1859_v55  ;;  %v3556_v55 = vrot.slane %v3554_v43, 3  ;;  %v5542_v43 = vld [vmem:[%s5899_s9 + $0x50] sm:$0xff] }
 0x1d6   : > { %v1344_v39 = vpop.f32.mrf.mxu2 }
 0x1d7   : > { %v1427_v16 = vadd.f32 %v1344_v39, %v993_v48  ;;  %v6540_v21 = vpop.f32.mrf.mxu3  ;;  %v3557_v39 = vor.u32 %v3556_v55, %v3553_v15  ;;  %v3051_v55 = vrot.slane %v5542_v43, 2 }
 0x1d8   : > { %v913_v14 = vpop.f32.mrf.mxu1 }
 0x1d9   : > { %v1860_v31 = vadd.f32 %v6492_v47, %v1427_v16  ;;  %v2347_v17 = vpop.f32.mrf.mxu0  ;;  %v994_v52 = vadd.f32 %v913_v14, %v6029_v20  ;;  %v2616_v20 = vrot.slane %v5523_v38, 2 }
 0x1db   : > { %5137 = vmatmul.msk.bf16.gmra.mxu1 %vm297_vm1, %v2615_v35  ;;  %5228 = vmatmul.msk.bf16.gmra.mxu2 %vm297_vm1, %v3048_v51  ;;  %v6547_v0 = vadd.f32 %v2344_v5, %v1860_v31  ;;  %v2617_v35 = vsel %vm2602_vm6, %v2614_v23, %v2616_v20  ;;  %v5562_v23 = vld [vmem:[%s5899_s9 + $0x60] sm:$0xff] }
 0x1dc   : > { %5410 = vmatmul.msk.bf16.gmra.mxu0 %vm297_vm1, %v4049_v28  ;;  %5321 = vmatmul.msk.bf16.gmra.mxu3 %vm297_vm1, %v3549_v54  ;;  %v4051_v28 = vsel %vm4036_vm7, %v4048_v41, %v4050_v13 }
 0x1de   : > { %v1347_v47 = vpop.f32.mrf.mxu2 }
 0x1df   : > { %v1428_v30 = vadd.f32 %v1347_v47, %v994_v52  ;;  %v6555_v7 = vpop.f32.mrf.mxu3  ;;  %v3560_v52 = vshrl.u32 %v5562_v23, 16  ;;  %v3563_v47 = vshll.u32 %v5562_v23, 16 }
 0x1e0   : > { %v915_v10 = vpop.f32.mrf.mxu1 }
 0x1e1   : > { %v1861_v3 = vadd.f32 %v6507_v33, %v1428_v30  ;;  %v2349_v45 = vpop.f32.mrf.mxu0  ;;  %v995_v22 = vadd.f32 %v915_v10, %v6040_v34  ;;  %v3050_v33 = vsel %vm2602_vm6, %v3047_v63, %v3049_v50  ;;  %v3558_v34 = vsel %vm3469_vm5, %v3548_v27, %v3557_v39  ;;  %v6981_v63 = vld [vmem:[#allocation6_spill] sm:$0xff]  ;;  %v5524_v27 = vld [vmem:[%s5899_s9 + $0x48] sm:$0xff] }
 0x1e2   : > { %v2618_v15 = vrot.slane %v5524_v27, 2  ;;  %v5543_v27 = vld [vmem:[%s5899_s9 + $0x58] sm:$0xff] }
 0x1e3   : > { %v6559_v5 = vadd.f32 %v2347_v17, %v1861_v3  ;;  %v3562_v3 = vrot.slane %v3560_v52, 2 }
 0x1e6   : > { %v1349_v48 = vpop.f32.mrf.mxu2 }
 0x1e7   : > { %v1429_v16 = vadd.f32 %v1349_v48, %v995_v22  ;;  %v6564_v51 = vpop.f32.mrf.mxu3  ;;  %v6982_v22 = vld [vmem:[#allocation7_spill] sm:$0xff] }
 0x1e8   : > { %v918_v14 = vpop.f32.mrf.mxu1 }
 0x1e9   : > { %v1862_v31 = vadd.f32 %v6516_v49, %v1429_v16  ;;  %v2352_v17 = vpop.f32.mrf.mxu0  ;;  %v996_v44 = vadd.f32 %v918_v14, %v6981_v63  ;;  %v4052_v16 = vrot.slane %v5578_v42, 3  ;;  %v5579_v42 = vld [vmem:[%s5899_s9 + $0x58] sm:$0xff] }
 0x1eb   : > { %5138 = vmatmul.msk.bf16.gmra.mxu1 %vm297_vm1, %v2617_v35  ;;  %5229 = vmatmul.msk.bf16.gmra.mxu2 %vm297_vm1, %v3050_v33  ;;  %v6571_v54 = vadd.f32 %v2349_v45, %v1862_v31  ;;  %v3565_v45 = vrot.slane %v3563_v47, 3  ;;  %v4053_v63 = vsel %vm4036_vm7, %v4050_v13, %v4052_v16 }
 0x1ec   : > { %5411 = vmatmul.msk.bf16.gmra.mxu0 %vm297_vm1, %v4051_v28  ;;  %5322 = vmatmul.msk.bf16.gmra.mxu3 %vm297_vm1, %v3558_v34  ;;  %v2619_v28 = vsel %vm2602_vm6, %v2616_v20, %v2618_v15  ;;  %v5563_v20 = vld [vmem:[%s5899_s9 + $0x68] sm:$0xff] }
 0x1ed   : > { %v3566_v35 = vor.u32 %v3565_v45, %v3562_v3  ;;  %v3569_v47 = vshrl.u32 %v5563_v20, 16 }
 0x1ee   : > { %v1352_v49 = vpop.f32.mrf.mxu2 }
 0x1ef   : > { %v1430_v41 = vadd.f32 %v1352_v49, %v996_v44  ;;  %v6579_v30 = vpop.f32.mrf.mxu3  ;;  %v3567_v44 = vsel %vm3469_vm5, %v3557_v39, %v3566_v35  ;;  %v5525_v39 = vld [vmem:[%s5899_s9 + $0x50] sm:$0xff]  ;;  %v3571_v3 = vrot.slane %v3569_v47, 2 }
 0x1f0   : > { %v920_v6 = vpop.f32.mrf.mxu1 }
 0x1f1   : > { %v1863_v10 = vadd.f32 %v6531_v9, %v1430_v41  ;;  %v2354_v38 = vpop.f32.mrf.mxu0  ;;  %v997_v48 = vadd.f32 %v920_v6, %v6982_v22  ;;  %v3052_v9 = vsel %vm2602_vm6, %v3049_v50, %v3051_v55  ;;  %v6983_v50 = vld [vmem:[#allocation8_spill] sm:$0xff]  ;;  %v3572_v41 = vshll.u32 %v5563_v20, 16 }
 0x1f3   : > { %v6583_v58 = vadd.f32 %v2352_v17, %v1863_v10  ;;  %v3574_v45 = vrot.slane %v3572_v41, 3 }
 0x1f6   : > { %v1354_v14 = vpop.f32.mrf.mxu2 }
 0x1f7   : > { %v1431_v33 = vadd.f32 %v1354_v14, %v997_v48  ;;  %v6588_v34 = vpop.f32.mrf.mxu3  ;;  %v2620_v48 = vrot.slane %v5525_v39, 2  ;;  %v3053_v14 = vrot.slane %v5543_v27, 2  ;;  %v6629_v27 = vld [vmem:[%s5899_s9 + $0x60] sm:$0xff] }
 0x1f8   : > { %v923_v31 = vpop.f32.mrf.mxu1 }
 0x1f9   : > { %v1864_v23 = vadd.f32 %v6540_v21, %v1431_v33  ;;  %v2357_v17 = vpop.f32.mrf.mxu0  ;;  %v998_v52 = vadd.f32 %v923_v31, %v6983_v50  ;;  %v6984_v33 = vld [vmem:[#allocation9_spill] sm:$0xff]  ;;  %v2621_v20 = vsel %vm2602_vm6, %v2618_v15, %v2620_v48  ;;  %v5564_v15 = vld [vmem:[%s5899_s9 + $0x70] sm:$0xff] }
 0x1fb   : > { %5139 = vmatmul.msk.bf16.gmra.mxu1 %vm297_vm1, %v2619_v28  ;;  %5230 = vmatmul.msk.bf16.gmra.mxu2 %vm297_vm1, %v3052_v9  ;;  %v6595_v49 = vadd.f32 %v2354_v38, %v1864_v23  ;;  %v4054_v28 = vrot.slane %v5579_v42, 3  ;;  %v3575_v23 = vor.u32 %v3574_v45, %v3571_v3  ;;  %v6634_v42 = vld [vmem:[%s5899_s9 + $0x60] sm:$0xff] }
 0x1fc   : > { %5412 = vmatmul.msk.bf16.gmra.mxu0 %vm297_vm1, %v4053_v63  ;;  %5323 = vmatmul.msk.bf16.gmra.mxu3 %vm297_vm1, %v3567_v44 }
 0x1fd   : > { %v3576_v47 = vsel %vm3469_vm5, %v3566_v35, %v3575_v23  ;;  %v6626_v35 = vld [vmem:[%s5899_s9 + $0x58] sm:$0xff] }
 0x1fe   : > { %v1357_v21 = vpop.f32.mrf.mxu2 }
 0x1ff   : > { %v1432_v13 = vadd.f32 %v1357_v21, %v998_v52  ;;  %v6603_v43 = vpop.f32.mrf.mxu3  ;;  %v4055_v21 = vsel %vm4036_vm7, %v4052_v16, %v4054_v28 }
 0x200   : > { %v925_v6 = vpop.f32.mrf.mxu1 }
 0x201   : > { %v1865_v10 = vadd.f32 %v6555_v7, %v1432_v13  ;;  %v2359_v38 = vpop.f32.mrf.mxu0  ;;  %v999_v31 = vadd.f32 %v925_v6, %v6984_v33  ;;  %v3054_v7 = vsel %vm2602_vm6, %v3051_v55, %v3053_v14  ;;  %v3578_v13 = vshrl.u32 %v5564_v15, 16 }
 0x202   : > { %v3581_v6 = vshll.u32 %v5564_v15, 16  ;;  %v2622_v33 = vrot.slane %v6626_v35, 2 }
 0x203   : > { %v6607_v22 = vadd.f32 %v2357_v17, %v1865_v10  ;;  %v3580_v3 = vrot.slane %v3578_v13, 2 }
 0x204   : > { %v3583_v45 = vrot.slane %v3581_v6, 3 }
 0x206   : > { %v1359_v9 = vpop.f32.mrf.mxu2 }
 0x207   : > { %v1433_v63 = vadd.f32 %v1359_v9, %v999_v31  ;;  %v6612_v50 = vpop.f32.mrf.mxu3  ;;  %v3055_v31 = vrot.slane %v6629_v27, 2 }
 0x208   : > { %v2706_v44 = vpop.f32.mrf.mxu1 }
 0x209   : > { %v1866_v52 = vadd.f32 %v6564_v51, %v1433_v63  ;;  %v4140_v17 = vpop.f32.mrf.mxu0  ;;  %v2832_v55 = vadd.f32 %v2706_v44, %v6166_v12  ;;  %v4056_v63 = vrot.slane %v6634_v42, 3  ;;  %v3056_v15 = vsel %vm2602_vm6, %v3053_v14, %v3055_v31 }
 0x20b   : > { %5140 = vmatmul.msk.bf16.gmra.mxu1 %vm297_vm1, %v2621_v20  ;;  %5231 = vmatmul.msk.bf16.gmra.mxu2 %vm297_vm1, %v3054_v7  ;;  %v6619_v41 = vadd.f32 %v2359_v38, %v1866_v52  ;;  %v3584_v20 = vor.u32 %v3583_v45, %v3580_v3  ;;  %v6644_v52 = vld [vmem:[%s6966_s2] ss:$0 sm:$0xff]  ;;  %v6668_v45 = vld [vmem:[%s5899_s9 + $0x68] sm:$0xff] }
 0x20c   : > { %5413 = vmatmul.msk.bf16.gmra.mxu0 %vm297_vm1, %v4055_v21  ;;  %5324 = vmatmul.msk.bf16.gmra.mxu3 %vm297_vm1, %v3576_v47  ;;  %v2623_v47 = vsel %vm2602_vm6, %v2620_v48, %v2622_v33  ;;  %v5565_v48 = vld [vmem:[%s5899_s9 + $0x78] sm:$0xff]  ;;  %v6665_v3 = vld [vmem:[%s5899_s9 + $0x60] sm:$0xff] }
 0x20d   : > { %v3585_v13 = vsel %vm3469_vm5, %v3575_v23, %v3584_v20  ;;  %v3587_v23 = vshrl.u32 %v5565_v48, 16 }
 0x20e   : > { %v3139_v51 = vpop.f32.mrf.mxu2 }
 0x20f   : > { %v3265_v16 = vadd.f32 %v3139_v51, %v2832_v55  ;;  %v6631_v10 = vpop.f32.mrf.mxu3 }
 0x210   : > { %v2708_v39 = vpop.f32.mrf.mxu1 }
 0x211   : > { %v4142_v38 = vpop.f32.mrf.mxu0  ;;  %v3832_v12 = vadd.f32 %v6579_v30, %v3265_v16  ;;  %v2833_v9 = vadd.f32 %v2708_v39, %v6179_v32  ;;  %v3590_v39 = vshll.u32 %v5565_v48, 16 }
 0x213   : > { %v4266_v7 = vadd.f32 %v4140_v17, %v3832_v12  ;;  %v4057_v17 = vsel %vm4036_vm7, %v4054_v28, %v4056_v63 }
 0x215   : > { %v4378_v6 = vadd.f32 %v6644_v52, %v4266_v7  ;;  %v6673_v7 = vld [vmem:[%s5899_s9 + $0x68] sm:$0xff] }
 0x216   : > { %v3141_v44 = vpop.f32.mrf.mxu2 }
 0x217   : > { %v3266_v21 = vadd.f32 %v3141_v44, %v2833_v9  ;;  %v6648_v55 = vpop.f32.mrf.mxu3  ;;  %v4414_v35 = vmax.f32 %v4378_v6, 0.0 }
 0x218   : > { %v2711_v30 = vpop.f32.mrf.mxu1 }
 0x219   : > { %v3833_v32 = vadd.f32 %v6588_v34, %v3266_v21  ;;  %v4145_v51 = vpop.f32.mrf.mxu0  ;;  %v2834_v14 = vadd.f32 %v2711_v30, %v6190_v60  ;;  %v3589_v60 = vrot.slane %v3587_v23, 2  ;;  %v3592_v21 = vrot.slane %v3590_v39, 3 }
 0x21b   : > { %v4267_v16 = vadd.f32 %v4142_v38, %v3833_v32  ;;  %5141 = vmatmul.msk.bf16.gmra.mxu1 %vm297_vm1, %v2623_v47  ;;  %5232 = vmatmul.msk.bf16.gmra.mxu2 %vm297_vm1, %v3056_v15  ;;  %v2624_v47 = vrot.slane %v6665_v3, 2  ;;  %v3057_v15 = vrot.slane %v6668_v45, 2  ;;  %v3593_v6 = vor.u32 %v3592_v21, %v3589_v60 }
 0x21c   : > { %5414 = vmatmul.msk.bf16.gmra.mxu0 %vm297_vm1, %v4057_v17  ;;  %5325 = vmatmul.msk.bf16.gmra.mxu3 %vm297_vm1, %v3585_v13  ;;  %v4058_v17 = vrot.slane %v6673_v7, 3  ;;  %v6702_v7 = vld [vmem:[%s5899_s9 + $0x70] sm:$0xff] }
 0x21d   : > { %v4379_v34 = vadd.f32 %v6644_v52, %v4267_v16 }
 0x21e   : > { %v3144_v28 = vpop.f32.mrf.mxu2 }
 0x21f   : > { %v4415_v27 = vmax.f32 %v4379_v34, 0.0  ;;  %v3267_v38 = vadd.f32 %v3144_v28, %v2834_v14  ;;  %v6670_v12 = vpop.f32.mrf.mxu3  ;;  %v2625_v14 = vsel %vm2602_vm6, %v2622_v33, %v2624_v47  ;;  %v3058_v28 = vsel %vm2602_vm6, %v3055_v31, %v3057_v15  ;;  %v5566_v33 = vld [vmem:[%s5899_s9 + $0x80] sm:$0xff] }
 0x220   : > { %v2713_v42 = vpop.f32.mrf.mxu1 }
 0x221   : > { %v5591_v9 = vpack.c.bf16 %v4415_v27, %v4414_v35  ;;  %v4147_v44 = vpop.f32.mrf.mxu0  ;;  %v3834_v30 = vadd.f32 %v6603_v43, %v3267_v38  ;;  %v2835_v32 = vadd.f32 %v2713_v42, %v6203_v1  ;;  %v4059_v35 = vsel %vm4036_vm7, %v4056_v63, %v4058_v17 }
 0x222   : > { %v3594_v1 = vsel %vm3469_vm5, %v3584_v20, %v3593_v6  ;;  %v3596_v20 = vshrl.u32 %v5566_v33, 16 }
 0x223   : > { %5592 = vst [vmem:[%s6675_s6] sm:$0xff] %v5591_v9   ;;  %v4268_v16 = vadd.f32 %v4145_v51, %v3834_v30  ;;  %v3599_v51 = vshll.u32 %v5566_v33, 16 }
 0x225   : > { %v4380_v27 = vadd.f32 %v6644_v52, %v4268_v16 }
 0x226   : > { %v3146_v13 = vpop.f32.mrf.mxu2 }
 0x227   : > { %v3268_v48 = vadd.f32 %v3146_v13, %v2835_v32  ;;  %v6685_v23 = vpop.f32.mrf.mxu3  ;;  %v4416_v42 = vmax.f32 %v4380_v27, 0.0  ;;  %v6707_v32 = vld [vmem:[%s5899_s9 + $0x70] sm:$0xff]  ;;  %v3601_v13 = vrot.slane %v3599_v51, 3 }
 0x228   : > { %v2716_v34 = vpop.f32.mrf.mxu1 }
 0x229   : > { %v3835_v43 = vadd.f32 %v6612_v50, %v3268_v48  ;;  %v4150_v39 = vpop.f32.mrf.mxu0  ;;  %v2836_v31 = vadd.f32 %v2716_v34, %v6214_v61  ;;  %v3598_v61 = vrot.slane %v3596_v20, 2  ;;  %v3059_v34 = vrot.slane %v6702_v7, 2  ;;  %v6731_v7 = vld [vmem:[%s5899_s9 + $0x70] sm:$0xff] }
 0x22b   : > { %v4269_v38 = vadd.f32 %v4147_v44, %v3835_v43  ;;  %5142 = vmatmul.msk.bf16.gmra.mxu1 %vm297_vm1, %v2625_v14  ;;  %5233 = vmatmul.msk.bf16.gmra.mxu2 %vm297_vm1, %v3058_v28  ;;  %v6699_v44 = vld [vmem:[%s5899_s9 + $0x68] sm:$0xff]  ;;  %v4060_v28 = vrot.slane %v6707_v32, 3 }
 0x22c   : > { %5415 = vmatmul.msk.bf16.gmra.mxu0 %vm297_vm1, %v4059_v35  ;;  %5326 = vmatmul.msk.bf16.gmra.mxu3 %vm297_vm1, %v3594_v1  ;;  %v2626_v48 = vrot.slane %v6699_v44, 2  ;;  %v3602_v35 = vor.u32 %v3601_v13, %v3598_v61  ;;  %v6739_v13 = vld [vmem:[%s5899_s9 + $0x78] sm:$0xff] }
 0x22d   : > { %v4381_v50 = vadd.f32 %v6644_v52, %v4269_v38  ;;  %v4061_v20 = vsel %vm4036_vm7, %v4058_v17, %v4060_v28 }
 0x22e   : > { %v3149_v63 = vpop.f32.mrf.mxu2  ;;  %v2627_v33 = vsel %vm2602_vm6, %v2624_v47, %v2626_v48  ;;  %v5567_v47 = vld [vmem:[%s5899_s9 + $0x88] sm:$0xff] }
 0x22f   : > { %v4417_v3 = vmax.f32 %v4381_v50, 0.0  ;;  %v3269_v45 = vadd.f32 %v3149_v63, %v2836_v31  ;;  %v6704_v60 = vpop.f32.mrf.mxu3  ;;  %v3060_v50 = vsel %vm2602_vm6, %v3057_v15, %v3059_v34 }
 0x230   : > { %v2718_v9 = vpop.f32.mrf.mxu1 }
 0x231   : > { %v5596_v21 = vpack.c.bf16 %v4417_v3, %v4416_v42  ;;  %v4152_v30 = vpop.f32.mrf.mxu0  ;;  %v3836_v16 = vadd.f32 %v6631_v10, %v3269_v45  ;;  %v2837_v14 = vadd.f32 %v2718_v9, %v6227_v59  ;;  %v3603_v59 = vsel %vm3469_vm5, %v3593_v6, %v3602_v35 }
 0x232   : > { %v3605_v6 = vshrl.u32 %v5567_v47, 16 }
 0x233   : > { %5678 = vst [vmem:[%s6675_s6 + $0x8] sm:$0xff] %v5596_v21   ;;  %v4270_v1 = vadd.f32 %v4150_v39, %v3836_v16  ;;  %v3608_v39 = vshll.u32 %v5567_v47, 16  ;;  %v6734_v21 = vld [vmem:[%s5899_s9 + $0x78] sm:$0xff] }
 0x235   : > { %v4382_v51 = vadd.f32 %v6644_v52, %v4270_v1  ;;  %v3610_v16 = vrot.slane %v3608_v39, 3  ;;  %v3061_v1 = vrot.slane %v6734_v21, 2 }
 0x236   : > { %v3151_v43 = vpop.f32.mrf.mxu2 }
 0x237   : > { %v3270_v27 = vadd.f32 %v3151_v43, %v2837_v14  ;;  %v6717_v31 = vpop.f32.mrf.mxu3  ;;  %v4418_v3 = vmax.f32 %v4382_v51, 0.0  ;;  %v2628_v43 = vrot.slane %v6731_v7, 2  ;;  %v6766_v7 = vld [vmem:[%s5899_s9 + $0x80] sm:$0xff] }
 0x238   : > { %v2721_v38 = vpop.f32.mrf.mxu1 }
 0x239   : > { %v3837_v10 = vadd.f32 %v6648_v55, %v3270_v27  ;;  %v4155_v63 = vpop.f32.mrf.mxu0  ;;  %v2838_v15 = vadd.f32 %v2721_v38, %v6238_v4  ;;  %v3607_v4 = vrot.slane %v3605_v6, 2  ;;  %v4062_v38 = vrot.slane %v6739_v13, 3  ;;  %v6771_v13 = vld [vmem:[%s5899_s9 + $0x80] sm:$0xff] }
 0x23a   : > { %v2629_v51 = vsel %vm2602_vm6, %v2626_v48, %v2628_v43  ;;  %v5568_v48 = vld [vmem:[%s5899_s9 + $0x90] sm:$0xff] }
 0x23b   : > { %v4271_v42 = vadd.f32 %v4152_v30, %v3837_v10  ;;  %5143 = vmatmul.msk.bf16.gmra.mxu1 %vm297_vm1, %v2627_v33  ;;  %5234 = vmatmul.msk.bf16.gmra.mxu2 %vm297_vm1, %v3060_v50  ;;  %v3611_v50 = vor.u32 %v3610_v16, %v3607_v4 }
 0x23c   : > { %5416 = vmatmul.msk.bf16.gmra.mxu0 %vm297_vm1, %v4061_v20  ;;  %5327 = vmatmul.msk.bf16.gmra.mxu3 %vm297_vm1, %v3603_v59 }
 0x23d   : > { %v4383_v55 = vadd.f32 %v6644_v52, %v4271_v42  ;;  %v3062_v42 = vsel %vm2602_vm6, %v3059_v34, %v3061_v1 }
 0x23e   : > { %v3154_v17 = vpop.f32.mrf.mxu2 }
 0x23f   : > { %v4419_v45 = vmax.f32 %v4383_v55, 0.0  ;;  %v3271_v9 = vadd.f32 %v3154_v17, %v2838_v15  ;;  %v6736_v30 = vpop.f32.mrf.mxu3  ;;  %v4063_v15 = vsel %vm4036_vm7, %v4060_v28, %v4062_v38 }
 0x240   : > { %v2723_v44 = vpop.f32.mrf.mxu1 }
 0x241   : > { %v5601_v32 = vpack.c.bf16 %v4419_v45, %v4418_v3  ;;  %v4157_v61 = vpop.f32.mrf.mxu0  ;;  %v3838_v14 = vadd.f32 %v6670_v12, %v3271_v9  ;;  %v2839_v27 = vadd.f32 %v2723_v44, %v6251_v19  ;;  %v3612_v19 = vsel %vm3469_vm5, %v3602_v35, %v3611_v50  ;;  %v6763_v44 = vld [vmem:[%s5899_s9 + $0x78] sm:$0xff] }
 0x242   : > { %v3614_v35 = vshrl.u32 %v5568_v48, 16 }
 0x243   : > { %5679 = vst [vmem:[%s6675_s6 + $0x10] sm:$0xff] %v5601_v32   ;;  %v4272_v10 = vadd.f32 %v4155_v63, %v3838_v14  ;;  %v3617_v63 = vshll.u32 %v5568_v48, 16  ;;  %v2630_v14 = vrot.slane %v6763_v44, 2  ;;  %v6795_v44 = vld [vmem:[%s5899_s9 + $0x80] sm:$0xff] }
 0x245   : > { %v4384_v17 = vadd.f32 %v6644_v52, %v4272_v10  ;;  %v3619_v4 = vrot.slane %v3617_v63, 3 }
 0x246   : > { %v3156_v33 = vpop.f32.mrf.mxu2 }
 0x247   : > { %v3272_v20 = vadd.f32 %v3156_v33, %v2839_v27  ;;  %v6749_v47 = vpop.f32.mrf.mxu3  ;;  %v4420_v39 = vmax.f32 %v4384_v17, 0.0  ;;  %v3063_v27 = vrot.slane %v6766_v7, 2  ;;  %v6985_v33 = vld [vmem:[#allocation10_spill] sm:$0xff]  ;;  %v6798_v7 = vld [vmem:[%s5899_s9 + $0x88] sm:$0xff] }
 0x248   : > { %v2726_v59 = vpop.f32.mrf.mxu1 }
 0x249   : > { %v3839_v12 = vadd.f32 %v6685_v23, %v3272_v20  ;;  %v4160_v55 = vpop.f32.mrf.mxu0  ;;  %v2840_v34 = vadd.f32 %v2726_v59, %v6262_v24  ;;  %v3616_v24 = vrot.slane %v3614_v35, 2  ;;  %v4064_v20 = vrot.slane %v6771_v13, 3 }
 0x24a   : > { %v3064_v17 = vsel %vm2602_vm6, %v3061_v1, %v3063_v27  ;;  %v6986_v1 = vld [vmem:[#allocation11_spill] sm:$0xff] }
 0x24b   : > { %v4273_v6 = vadd.f32 %v4157_v61, %v3839_v12  ;;  %5144 = vmatmul.msk.bf16.gmra.mxu1 %vm297_vm1, %v2629_v51  ;;  %5235 = vmatmul.msk.bf16.gmra.mxu2 %vm297_vm1, %v3062_v42  ;;  %v3620_v51 = vor.u32 %v3619_v4, %v3616_v24  ;;  %v6803_v24 = vld [vmem:[%s5899_s9 + $0x88] sm:$0xff] }
 0x24c   : > { %5417 = vmatmul.msk.bf16.gmra.mxu0 %vm297_vm1, %v4063_v15  ;;  %5328 = vmatmul.msk.bf16.gmra.mxu3 %vm297_vm1, %v3612_v19  ;;  %v2631_v19 = vsel %vm2602_vm6, %v2628_v43, %v2630_v14  ;;  %v5569_v43 = vld [vmem:[%s5899_s9 + $0x98] sm:$0xff] }
 0x24d   : > { %v4385_v23 = vadd.f32 %v6644_v52, %v4273_v6  ;;  %v3626_v63 = vshll.u32 %v5569_v43, 16 }
 0x24e   : > { %v3159_v28 = vpop.f32.mrf.mxu2 }
 0x24f   : > { %v4421_v3 = vmax.f32 %v4385_v23, 0.0  ;;  %v3273_v45 = vadd.f32 %v3159_v28, %v2840_v34  ;;  %v6768_v21 = vpop.f32.mrf.mxu3  ;;  %v4065_v23 = vsel %vm4036_vm7, %v4062_v38, %v4064_v20  ;;  %v3621_v34 = vsel %vm3469_vm5, %v3611_v50, %v3620_v51 }
 0x250   : > { %v2728_v9 = vpop.f32.mrf.mxu1  ;;  %v3623_v50 = vshrl.u32 %v5569_v43, 16 }
 0x251   : > { %v5606_v32 = vpack.c.bf16 %v4421_v3, %v4420_v39  ;;  %v4162_v61 = vpop.f32.mrf.mxu0  ;;  %v3840_v16 = vadd.f32 %v6704_v60, %v3273_v45  ;;  %v2841_v10 = vadd.f32 %v2728_v9, %v6985_v33 }
 0x252   : > { %v3625_v4 = vrot.slane %v3623_v50, 2 }
 0x253   : > { %5680 = vst [vmem:[%s6675_s6 + $0x18] sm:$0xff] %v5606_v32   ;;  %v4274_v42 = vadd.f32 %v4160_v55, %v3840_v16  ;;  %v3628_v16 = vrot.slane %v3626_v63, 3 }
 0x255   : > { %v4386_v28 = vadd.f32 %v6644_v52, %v4274_v42  ;;  %v6987_v42 = vld [vmem:[#allocation12_spill] sm:$0xff] }
 0x256   : > { %v3161_v59 = vpop.f32.mrf.mxu2 }
 0x257   : > { %v3274_v12 = vadd.f32 %v3161_v59, %v2841_v10  ;;  %v6781_v6 = vpop.f32.mrf.mxu3  ;;  %v4422_v39 = vmax.f32 %v4386_v28, 0.0  ;;  %v2632_v10 = vrot.slane %v6795_v44, 2  ;;  %v3065_v59 = vrot.slane %v6798_v7, 2 }
 0x258   : > { %v2731_v15 = vpop.f32.mrf.mxu1 }
 0x259   : > { %v3841_v60 = vadd.f32 %v6717_v31, %v3274_v12  ;;  %v4165_v48 = vpop.f32.mrf.mxu0  ;;  %v2842_v55 = vadd.f32 %v2731_v15, %v6986_v1  ;;  %v4066_v15 = vrot.slane %v6803_v24, 3  ;;  %v2633_v28 = vsel %vm2602_vm6, %v2630_v14, %v2632_v10 }
 0x25b   : > { %v4275_v35 = vadd.f32 %v4162_v61, %v3841_v60  ;;  %5145 = vmatmul.msk.bf16.gmra.mxu1 %vm297_vm1, %v2631_v19  ;;  %5236 = vmatmul.msk.bf16.gmra.mxu2 %vm297_vm1, %v3064_v17  ;;  %v3629_v17 = vor.u32 %v3628_v16, %v3625_v4  ;;  %v4067_v1 = vsel %vm4036_vm7, %v4064_v20, %v4066_v15 }
 0x25c   : > { %5418 = vmatmul.msk.bf16.gmra.mxu0 %vm297_vm1, %v4065_v23  ;;  %5329 = vmatmul.msk.bf16.gmra.mxu3 %vm297_vm1, %v3621_v34 }
 0x25d   : > { %v4387_v31 = vadd.f32 %v6644_v52, %v4275_v35  ;;  %v3066_v35 = vsel %vm2602_vm6, %v3063_v27, %v3065_v59  ;;  %v6988_v27 = vld [vmem:[#allocation13_spill] sm:$0xff] }
 0x25e   : > { %v3164_v38 = vpop.f32.mrf.mxu2 }
 0x25f   : > { %v4423_v3 = vmax.f32 %v4387_v31, 0.0  ;;  %v3275_v45 = vadd.f32 %v3164_v38, %v2842_v55  ;;  %v6800_v32 = vpop.f32.mrf.mxu3  ;;  %v3373_v55 = vld [vmem:[%s5899_s9 + $0xa0] sm:$0x7]  ;;  %v3630_v38 = vsel %vm3469_vm5, %v3620_v51, %v3629_v17 }
 0x260   : > { %v2733_v9 = vpop.f32.mrf.mxu1  ;;  %v3449_v50 = vunpack.c.l.b16 %v3373_v55 }
 0x261   : > { %v5611_v61 = vpack.c.bf16 %v4423_v3, %v4422_v39  ;;  %v4167_v13 = vpop.f32.mrf.mxu0  ;;  %v3842_v33 = vadd.f32 %v6736_v30, %v3275_v45  ;;  %v2843_v12 = vadd.f32 %v2733_v9, %v6987_v42 }
 0x262   : > { %v3468_v14 = vpack.c.b16 %v3449_v50, %v3449_v50 }
 0x263   : > { %5681 = vst [vmem:[%s6675_s6 + $0x20] sm:$0xff] %v5611_v61   ;;  %v4276_v60 = vadd.f32 %v4165_v48, %v3842_v33  ;;  %v5532_v61 = vld [vmem:[%s5899_s9 + $0x88] sm:$0xff]  ;;  %v5586_v33 = vld [vmem:[%s5899_s9 + $0x90] sm:$0xff] }
 0x264   : > { %v3632_v39 = vshrl.u32 %v3468_v14, 16  ;;  %v3635_v3 = vshll.u32 %v3468_v14, 16 }
 0x265   : > { %v4388_v63 = vadd.f32 %v6644_v52, %v4276_v60  ;;  %v2634_v60 = vrot.slane %v5532_v61, 2 }
 0x266   : > { %v3166_v19 = vpop.f32.mrf.mxu2  ;;  %v3634_v42 = vrot.slane %v3632_v39, 2 }
 0x267   : > { %v3276_v23 = vadd.f32 %v3166_v19, %v2843_v12  ;;  %v6813_v43 = vpop.f32.mrf.mxu3  ;;  %v4424_v45 = vmax.f32 %v4388_v63, 0.0  ;;  %v3637_v12 = vrot.slane %v3635_v3, 3  ;;  %v2635_v63 = vsel %vm2602_vm6, %v2632_v10, %v2634_v60 }
 0x268   : > { %v2736_v34 = vpop.f32.mrf.mxu1 }
 0x269   : > { %v3843_v30 = vadd.f32 %v6749_v47, %v3276_v23  ;;  %v4170_v31 = vpop.f32.mrf.mxu0  ;;  %v2844_v20 = vadd.f32 %v2736_v34, %v6988_v27  ;;  %v6989_v34 = vld [vmem:[#allocation14_spill] sm:$0xff] }
 0x26b   : > { %v4277_v48 = vadd.f32 %v4167_v13, %v3843_v30  ;;  %5146 = vmatmul.msk.bf16.gmra.mxu1 %vm297_vm1, %v2633_v28  ;;  %5237 = vmatmul.msk.bf16.gmra.mxu2 %vm297_vm1, %v3066_v35  ;;  %v5550_v13 = vld [vmem:[%s5899_s9 + $0x90] sm:$0xff]  ;;  %v4068_v35 = vrot.slane %v5586_v33, 3 }
 0x26c   : > { %5419 = vmatmul.msk.bf16.gmra.mxu0 %vm297_vm1, %v4067_v1  ;;  %5330 = vmatmul.msk.bf16.gmra.mxu3 %vm297_vm1, %v3630_v38  ;;  %v3067_v23 = vrot.slane %v5550_v13, 2  ;;  %v3638_v1 = vor.u32 %v3637_v12, %v3634_v42  ;;  %v5587_v13 = vld [vmem:[%s5899_s9 + $0x98] sm:$0xff] }
 0x26d   : > { %v4389_v47 = vadd.f32 %v6644_v52, %v4277_v48  ;;  %v4070_v42 = vrot.slane %v5587_v13, 3 }
 0x26e   : > { %v3169_v51 = vpop.f32.mrf.mxu2  ;;  %v3068_v48 = vsel %vm2602_vm6, %v3065_v59, %v3067_v23 }
 0x26f   : > { %v4425_v9 = vmax.f32 %v4389_v47, 0.0  ;;  %v3277_v44 = vadd.f32 %v3169_v51, %v2844_v20  ;;  %v6828_v24 = vpop.f32.mrf.mxu3  ;;  %v3639_v20 = vsel %vm3469_vm5, %v3629_v17, %v3638_v1 }
 0x270   : > { %v2738_v7 = vpop.f32.mrf.mxu1 }
 0x271   : > { %v5616_v4 = vpack.c.bf16 %v4425_v9, %v4424_v45  ;;  %v4172_v16 = vpop.f32.mrf.mxu0  ;;  %v3844_v19 = vadd.f32 %v6768_v21, %v3277_v44  ;;  %v2845_v28 = vadd.f32 %v2738_v7, %v6989_v34  ;;  %v4069_v21 = vsel %vm4036_vm7, %v4066_v15, %v4068_v35  ;;  %v5533_v45 = vld [vmem:[%s5899_s9 + $0x90] sm:$0xff]  ;;  %v5551_v9 = vld [vmem:[%s5899_s9 + $0x98] sm:$0xff] }
 0x273   : > { %5682 = vst [vmem:[%s6675_s6 + $0x28] sm:$0xff] %v5616_v4   ;;  %v4278_v55 = vadd.f32 %v4170_v31, %v3844_v19 }
 0x275   : > { %v4390_v51 = vadd.f32 %v6644_v52, %v4278_v55 }
 0x276   : > { %v3171_v30 = vpop.f32.mrf.mxu2 }
 0x277   : > { %v3278_v38 = vadd.f32 %v3171_v30, %v2845_v28  ;;  %v6836_v14 = vpop.f32.mrf.mxu3  ;;  %v4426_v15 = vmax.f32 %v4390_v51, 0.0 }
 0x278   : > { %v2741_v50 = vpop.f32.mrf.mxu1 }
 0x279   : > { %v3845_v47 = vadd.f32 %v6781_v6, %v3278_v38  ;;  %v4175_v27 = vpop.f32.mrf.mxu0  ;;  %v2846_v10 = vadd.f32 %v2741_v50, %v6354_v37  ;;  %v2636_v37 = vrot.slane %v5533_v45, 2  ;;  %v4071_v50 = vsel %vm4036_vm7, %v4068_v35, %v4070_v42 }
 0x27b   : > { %v4279_v31 = vadd.f32 %v4172_v16, %v3845_v47  ;;  %5147 = vmatmul.msk.bf16.gmra.mxu1 %vm297_vm1, %v2635_v63  ;;  %5238 = vmatmul.msk.bf16.gmra.mxu2 %vm297_vm1, %v3068_v48  ;;  %v3069_v16 = vrot.slane %v5551_v9, 2  ;;  %v2637_v30 = vsel %vm2602_vm6, %v2634_v60, %v2636_v37  ;;  %v2506_v63 = vld [vmem:[%s5899_s9 + $0x98] sm:$0x3]  ;;  %v2940_v48 = vld [vmem:[%s5899_s9 + $0xa0] sm:$0x3] }
 0x27c   : > { %5420 = vmatmul.msk.bf16.gmra.mxu0 %vm297_vm1, %v4069_v21  ;;  %5331 = vmatmul.msk.bf16.gmra.mxu3 %vm297_vm1, %v3639_v20  ;;  %v3940_v47 = vld [vmem:[%s5899_s9 + $0xa0] sm:$0x7]  ;;  %v2582_v60 = vunpack.c.l.b16 %v2506_v63  ;;  %s5700_s9 = smul.u32 144, %s5851_s16  ;;  %s4523_s16 = scalar_lea.sflag [#allocation4], %s161_s4 }
 0x27d   : > { %v4391_v6 = vadd.f32 %v6644_v52, %v4279_v31  ;;  %v3070_v1 = vsel %vm2602_vm6, %v3067_v23, %v3069_v16  ;;  %v3016_v23 = vunpack.c.l.b16 %v2940_v48  ;;  %v4016_v35 = vunpack.c.l.b16 %v3940_v47 }
 0x27e   : > { %v3174_v59 = vpop.f32.mrf.mxu2  ;;  %s4534_s17 = scalar_lea.hbm %s6967_s3, %s5700_s9 }
 0x27f   : > { %v4427_v17 = vmax.f32 %v4391_v6, 0.0  ;;  %v3279_v39 = vadd.f32 %v3174_v59, %v2846_v10  ;;  %v6850_v44 = vpop.f32.mrf.mxu3  ;;  %v2601_v59 = vpack.c.b16 %v2582_v60, %v2582_v60  ;;  %s4537_s20 = sshll.u32 %s4534_s17, 4  ;;  %s4538_s20 = int_to_ptr.hbm [resolvable:$true] %s4537_s20 }
 0x280   : > { %v2743_v3 = vpop.f32.mrf.mxu1  ;;  %s5758_s24 = sshra.s32 %s4538_s20, 4  ;;  %s5759_s24 = int_to_ptr.hbm [resolvable:$true] %s5758_s24 }
 0x281   : > { %v5621_v7 = vpack.c.bf16 %v4427_v17, %v4426_v15  ;;  %v4177_v61 = vpop.f32.mrf.mxu0  ;;  %v3846_v4 = vadd.f32 %v6800_v32, %v3279_v39  ;;  %v2847_v33 = vadd.f32 %v2743_v3, %v6372_v53  ;;  %v3035_v15 = vpack.c.b16 %v3016_v23, %v3016_v23  ;;  %s5760_s25 = scalar_lea.hbm %s5759_s24, 144  ;;  %p5765_p0 = scmp.lt.s32.totalorder %s5759_s24, %s6967_s3 }
 0x282   : > { %v4035_v3 = vpack.c.b16 %v4016_v35, %v4016_v35  ;;  %p5761_p11 = scmp.ne.s32.totalorder %s5759_s24, %s5760_s25  ;;  %p5766_p1 = scmp.lt.s32.totalorder %s5764_s28, %s5760_s25 }
 0x283   : > { %5683 = vst [vmem:[%s6675_s6 + $0x30] sm:$0xff] %v5621_v7   ;;  %v4280_v19 = vadd.f32 %v4175_v27, %v3846_v4  ;;  %v2638_v7 = vrot.slane %v2601_v59, 2 }
 0x284   : > { %p5762_p12 = pnand %p5761_p11, %p5868_p5  ;;  %p5767_p2 = por %p5766_p1, %p5765_p0 }
 0x285   : > { %v4392_v53 = vadd.f32 %v6644_v52, %v4280_v19 }
 0x286   : > { %v3176_v12 = vpop.f32.mrf.mxu2  ;;  %p5763_p13 = pneg %p5762_p12 }
 0x287   : > { %v3280_v34 = vadd.f32 %v3176_v12, %v2847_v33  ;;  %v6858_v55 = vpop.f32.mrf.mxu3  ;;  %v4428_v51 = vmax.f32 %v4392_v53, 0.0 }
 0x288   : > { %v2746_v28 = vpop.f32.mrf.mxu1  ;;  %p5768_p3 = pnand %p5767_p2, %p5763_p13 }
 0x289   : > { %v3847_v38 = vadd.f32 %v6813_v43, %v3280_v34  ;;  %v4180_v32 = vpop.f32.mrf.mxu0  ;;  %v2848_v27 = vadd.f32 %v2746_v28, %v6382_v57  ;;  %v4072_v57 = vrot.slane %v4035_v3, 3  ;;  %v2639_v34 = vsel %vm2602_vm6, %v2636_v37, %v2638_v7 }
 0x28b   : > { %v4281_v21 = vadd.f32 %v4177_v61, %v3847_v38  ;;  %5148 = vmatmul.msk.bf16.gmra.mxu1 %vm297_vm1, %v2637_v30  ;;  %5239 = vmatmul.msk.bf16.gmra.mxu2 %vm297_vm1, %v3070_v1  ;;  %v3071_v61 = vrot.slane %v3035_v15, 2  ;;  %v4073_v38 = vsel %vm4036_vm7, %v4070_v42, %v4072_v57 }
 0x28c   : > { %5421 = vmatmul.msk.bf16.gmra.mxu0 %vm297_vm1, %v4071_v50 }
 0x28d   : > { %v4393_v43 = vadd.f32 %v6644_v52, %v4281_v21  ;;  %v3072_v28 = vsel %vm2602_vm6, %v3069_v16, %v3071_v61 }
 0x28e   : > { %v3179_v20 = vpop.f32.mrf.mxu2 }
 0x28f   : > { %v4429_v31 = vmax.f32 %v4393_v43, 0.0  ;;  %v3281_v6 = vadd.f32 %v3179_v20, %v2848_v27  ;;  %v3756_v45 = vpop.f32.mrf.mxu3 }
 0x290   : > { %v2748_v10 = vpop.f32.mrf.mxu1 }
 0x291   : > { %v5626_v17 = vpack.c.bf16 %v4429_v31, %v4428_v51  ;;  %v4182_v39 = vpop.f32.mrf.mxu0  ;;  %v3848_v9 = vadd.f32 %v6828_v24, %v3281_v6  ;;  %v2849_v13 = vadd.f32 %v2748_v10, %v6394_v36 }
 0x293   : > { %5684 = vst [vmem:[%s6675_s6 + $0x38] sm:$0xff] %v5626_v17   ;;  %v4282_v33 = vadd.f32 %v4180_v32, %v3848_v9 }
 0x295   : > { %v4394_v24 = vadd.f32 %v6644_v52, %v4282_v33 }
 0x296   : > { %v3181_v4 = vpop.f32.mrf.mxu2 }
 0x297   : > { %v3282_v12 = vadd.f32 %v3181_v4, %v2849_v13  ;;  %v3758_v36 = vpop.f32.mrf.mxu3 }
 0x298   : > { %v2751_v19 = vpop.f32.mrf.mxu1 }
 0x299   : > { %v3849_v30 = vadd.f32 %v6836_v14, %v3282_v12  ;;  %v4185_v1 = vpop.f32.mrf.mxu0  ;;  %v2850_v16 = vadd.f32 %v2751_v19, %v6414_v8  ;;  %v4430_v14 = vmax.f32 %v4394_v24, 0.0 }
 0x29b   : > { %v4283_v50 = vadd.f32 %v4182_v39, %v3849_v30  ;;  %5149 = vmatmul.msk.bf16.gmra.mxu1 %vm297_vm1, %v2639_v34  ;;  %5240 = vmatmul.msk.bf16.gmra.mxu2 %vm297_vm1, %v3072_v28 }
 0x29c   : > { %5422 = vmatmul.msk.bf16.gmra.mxu0 %vm297_vm1, %v4073_v38 }
 0x29d   : > { %v4395_v37 = vadd.f32 %v6644_v52, %v4283_v50 }
 0x29e   : > { %v3184_v32 = vpop.f32.mrf.mxu2 }
 0x29f   : > { %v4431_v63 = vmax.f32 %v4395_v37, 0.0  ;;  %v3283_v48 = vadd.f32 %v3184_v32, %v2850_v16  ;;  %v3761_v43 = vpop.f32.mrf.mxu3 }
 0x2a0   : > { %v2753_v42 = vpop.f32.mrf.mxu1 }
 0x2a1   : > { %v5631_v47 = vpack.c.bf16 %v4431_v63, %v4430_v14  ;;  %v4187_v53 = vpop.f32.mrf.mxu0  ;;  %v3850_v21 = vadd.f32 %v6850_v44, %v3283_v48  ;;  %v2851_v60 = vadd.f32 %v2753_v42, %v6427_v26 }
 0x2a3   : > { %5685 = vst [vmem:[%s6675_s6 + $0x40] sm:$0xff] %v5631_v47   ;;  %v4284_v27 = vadd.f32 %v4185_v1, %v3850_v21 }
 0x2a5   : > { %v4396_v31 = vadd.f32 %v6644_v52, %v4284_v27 }
 0x2a6   : > { %v3186_v23 = vpop.f32.mrf.mxu2 }
 0x2a7   : > { %v3284_v35 = vadd.f32 %v3186_v23, %v2851_v60  ;;  %v4432_v44 = vmax.f32 %v4396_v31, 0.0  ;;  %v3763_v3 = vpop.f32.mrf.mxu3 }
 0x2a8   : > { %v2756_v20 = vpop.f32.mrf.mxu1 }
 0x2a9   : > { %v3851_v8 = vadd.f32 %v6858_v55, %v3284_v35  ;;  %v4190_v51 = vpop.f32.mrf.mxu0  ;;  %v2852_v59 = vadd.f32 %v2756_v20, %v6439_v2 }
 0x2ab   : > { %v4285_v6 = vadd.f32 %v4187_v53, %v3851_v8 }
 0x2ad   : > { %v4397_v10 = vadd.f32 %v6644_v52, %v4285_v6 }
 0x2ae   : > { %v3189_v15 = vpop.f32.mrf.mxu2 }
 0x2af   : > { %v4433_v17 = vmax.f32 %v4397_v10, 0.0  ;;  %v3285_v26 = vadd.f32 %v3189_v15, %v2852_v59  ;;  %v3766_v2 = vpop.f32.mrf.mxu3 }
 0x2b0   : > { %v2758_v39 = vpop.f32.mrf.mxu1 }
 0x2b1   : > { %v5636_v9 = vpack.c.bf16 %v4433_v17, %v4432_v44  ;;  %v4192_v7 = vpop.f32.mrf.mxu0  ;;  %v3852_v61 = vadd.f32 %v3756_v45, %v3285_v26  ;;  %v2853_v55 = vadd.f32 %v2758_v39, %v6451_v62 }
 0x2b3   : > { %5686 = vst [vmem:[%s6675_s6 + $0x48] sm:$0xff] %v5636_v9   ;;  %v4286_v57 = vadd.f32 %v4190_v51, %v3852_v61 }
 0x2b5   : > { %v4398_v34 = vadd.f32 %v6644_v52, %v4286_v57 }
 0x2b6   : > { %v3191_v13 = vpop.f32.mrf.mxu2 }
 0x2b7   : > { %v3286_v4 = vadd.f32 %v3191_v13, %v2853_v55  ;;  %v4434_v24 = vmax.f32 %v4398_v34, 0.0  ;;  %v3768_v14 = vpop.f32.mrf.mxu3 }
 0x2b8   : > { %v2761_v33 = vpop.f32.mrf.mxu1 }
 0x2b9   : > { %v3853_v12 = vadd.f32 %v3758_v36, %v3286_v4  ;;  %v4195_v19 = vpop.f32.mrf.mxu0  ;;  %v2854_v1 = vadd.f32 %v2761_v33, %v6463_v18 }
 0x2bb   : > { %v4287_v28 = vadd.f32 %v4192_v7, %v3853_v12 }
 0x2bd   : > { %v4399_v30 = vadd.f32 %v6644_v52, %v4287_v28 }
 0x2be   : > { %v3194_v38 = vpop.f32.mrf.mxu2 }
 0x2bf   : > { %v4435_v45 = vmax.f32 %v4399_v30, 0.0  ;;  %v3287_v50 = vadd.f32 %v3194_v38, %v2854_v1  ;;  %v3771_v20 = vpop.f32.mrf.mxu3 }
 0x2c0   : > { %v2763_v62 = vpop.f32.mrf.mxu1 }
 0x2c1   : > { %v5641_v37 = vpack.c.bf16 %v4435_v45, %v4434_v24  ;;  %v4197_v16 = vpop.f32.mrf.mxu0  ;;  %v3854_v32 = vadd.f32 %v3761_v43, %v3287_v50  ;;  %v2855_v36 = vadd.f32 %v2763_v62, %v6475_v29 }
 0x2c3   : > { %5687 = vst [vmem:[%s6675_s6 + $0x50] sm:$0xff] %v5641_v37   ;;  %v4288_v48 = vadd.f32 %v4195_v19, %v3854_v32 }
 0x2c5   : > { %v4400_v18 = vadd.f32 %v6644_v52, %v4288_v48 }
 0x2c6   : > { %v3196_v63 = vpop.f32.mrf.mxu2 }
 0x2c7   : > { %v3288_v42 = vadd.f32 %v3196_v63, %v2855_v36  ;;  %v4436_v43 = vmax.f32 %v4400_v18, 0.0  ;;  %v3773_v39 = vpop.f32.mrf.mxu3 }
 0x2c8   : > { %v2766_v47 = vpop.f32.mrf.mxu1 }
 0x2c9   : > { %v3855_v53 = vadd.f32 %v3763_v3, %v3288_v42  ;;  %v4200_v21 = vpop.f32.mrf.mxu0  ;;  %v2856_v27 = vadd.f32 %v2766_v47, %v6487_v40 }
 0x2cb   : > { %v4289_v60 = vadd.f32 %v4197_v16, %v3855_v53 }
 0x2cd   : > { %v4401_v23 = vadd.f32 %v6644_v52, %v4289_v60 }
 0x2ce   : > { %v3199_v35 = vpop.f32.mrf.mxu2 }
 0x2cf   : > { %v4437_v8 = vmax.f32 %v4401_v23, 0.0  ;;  %v3289_v51 = vadd.f32 %v3199_v35, %v2856_v27 }
 0x2d0   : > { %v2768_v29 = vpop.f32.mrf.mxu1 }
 0x2d1   : > { %v5646_v31 = vpack.c.bf16 %v4437_v8, %v4436_v43  ;;  %v4202_v6 = vpop.f32.mrf.mxu0  ;;  %v3856_v10 = vadd.f32 %v3766_v2, %v3289_v51  ;;  %v2857_v59 = vadd.f32 %v2768_v29, %v6499_v56  ;;  %v3776_v2 = vpop.f32.mrf.mxu3 }
 0x2d3   : > { %5688 = vst [vmem:[%s6675_s6 + $0x58] sm:$0xff] %v5646_v31   ;;  %v4290_v44 = vadd.f32 %v4200_v21, %v3856_v10 }
 0x2d5   : > { %v4402_v9 = vadd.f32 %v6644_v52, %v4290_v44 }
 0x2d6   : > { %v3201_v15 = vpop.f32.mrf.mxu2 }
 0x2d7   : > { %v3290_v17 = vadd.f32 %v3201_v15, %v2857_v59  ;;  %v4438_v57 = vmax.f32 %v4402_v9, 0.0 }
 0x2d8   : > { %v2771_v26 = vpop.f32.mrf.mxu1 }
 0x2d9   : > { %v3857_v3 = vadd.f32 %v3768_v14, %v3290_v17  ;;  %v4205_v40 = vpop.f32.mrf.mxu0  ;;  %v2858_v55 = vadd.f32 %v2771_v26, %v6511_v46  ;;  %v3778_v37 = vpop.f32.mrf.mxu3 }
 0x2db   : > { %v4291_v7 = vadd.f32 %v4202_v6, %v3857_v3 }
 0x2dd   : > { %v4403_v61 = vadd.f32 %v6644_v52, %v4291_v7 }
 0x2de   : > { %v3204_v13 = vpop.f32.mrf.mxu2 }
 0x2df   : > { %v4439_v4 = vmax.f32 %v4403_v61, 0.0  ;;  %v3291_v33 = vadd.f32 %v3204_v13, %v2858_v55 }
 0x2e0   : > { %v2773_v56 = vpop.f32.mrf.mxu1 }
 0x2e1   : > { %v5651_v12 = vpack.c.bf16 %v4439_v4, %v4438_v57  ;;  %v4207_v19 = vpop.f32.mrf.mxu0  ;;  %v3858_v34 = vadd.f32 %v3771_v20, %v3291_v33  ;;  %v2859_v28 = vadd.f32 %v2773_v56, %v6523_v25  ;;  %v3781_v60 = vpop.f32.mrf.mxu3 }
 0x2e3   : > { %5689 = vst [vmem:[%s6675_s6 + $0x60] sm:$0xff] %v5651_v12   ;;  %v4292_v1 = vadd.f32 %v4205_v40, %v3858_v34 }
 0x2e5   : > { %v4404_v46 = vadd.f32 %v6644_v52, %v4292_v1 }
 0x2e6   : > { %v3206_v30 = vpop.f32.mrf.mxu2 }
 0x2e7   : > { %v3292_v38 = vadd.f32 %v3206_v30, %v2859_v28  ;;  %v4440_v36 = vmax.f32 %v4404_v46, 0.0 }
 0x2e8   : > { %v2776_v24 = vpop.f32.mrf.mxu1 }
 0x2e9   : > { %v3859_v45 = vadd.f32 %v3773_v39, %v3292_v38  ;;  %v4210_v50 = vpop.f32.mrf.mxu0  ;;  %v2860_v32 = vadd.f32 %v2776_v24, %v6535_v11  ;;  %v3783_v15 = vpop.f32.mrf.mxu3 }
 0x2eb   : > { %v4293_v62 = vadd.f32 %v4207_v19, %v3859_v45 }
 0x2ed   : > { %v4405_v16 = vadd.f32 %v6644_v52, %v4293_v62 }
 0x2ee   : > { %v3209_v14 = vpop.f32.mrf.mxu2 }
 0x2ef   : > { %v4441_v63 = vmax.f32 %v4405_v16, 0.0  ;;  %v3293_v48 = vadd.f32 %v3209_v14, %v2860_v32 }
 0x2f0   : > { %v2778_v25 = vpop.f32.mrf.mxu1 }
 0x2f1   : > { %v5656_v42 = vpack.c.bf16 %v4441_v63, %v4440_v36  ;;  %v4212_v47 = vpop.f32.mrf.mxu0  ;;  %v3860_v53 = vadd.f32 %v3776_v2, %v3293_v48  ;;  %v2861_v21 = vadd.f32 %v2778_v25, %v6547_v0  ;;  %v3786_v55 = vpop.f32.mrf.mxu3 }
 0x2f3   : > { %5690 = vst [vmem:[%s6675_s6 + $0x68] sm:$0xff] %v5656_v42   ;;  %v4294_v23 = vadd.f32 %v4210_v50, %v3860_v53 }
 0x2f5   : > { %v4406_v11 = vadd.f32 %v6644_v52, %v4294_v23 }
 0x2f6   : > { %v3211_v18 = vpop.f32.mrf.mxu2 }
 0x2f7   : > { %v3294_v27 = vadd.f32 %v3211_v18, %v2861_v21  ;;  %v4442_v6 = vmax.f32 %v4406_v11, 0.0 }
 0x2f8   : > { %v2781_v35 = vpop.f32.mrf.mxu1 }
 0x2f9   : > { %v3861_v20 = vadd.f32 %v3778_v37, %v3294_v27  ;;  %v4215_v43 = vpop.f32.mrf.mxu0  ;;  %v2862_v29 = vadd.f32 %v2781_v35, %v6559_v5  ;;  %v3788_v30 = vpop.f32.mrf.mxu3 }
 0x2fb   : > { %v4295_v8 = vadd.f32 %v4212_v47, %v3861_v20 }
 0x2fd   : > { %v4407_v51 = vadd.f32 %v6644_v52, %v4295_v8 }
 0x2fe   : > { %v3214_v31 = vpop.f32.mrf.mxu2 }
 0x2ff   : > { %v4443_v10 = vmax.f32 %v4407_v51, 0.0  ;;  %v3295_v59 = vadd.f32 %v3214_v31, %v2862_v29 }
 0x300   : > { %v2783_v0 = vpop.f32.mrf.mxu1 }
 0x301   : > { %v5661_v44 = vpack.c.bf16 %v4443_v10, %v4442_v6  ;;  %v4217_v17 = vpop.f32.mrf.mxu0  ;;  %v3862_v26 = vadd.f32 %v3781_v60, %v3295_v59  ;;  %v2863_v39 = vadd.f32 %v2783_v0, %v6571_v54  ;;  %v3791_v14 = vpop.f32.mrf.mxu3 }
 0x303   : > { %5691 = vst [vmem:[%s6675_s6 + $0x70] sm:$0xff] %v5661_v44   ;;  %v4296_v40 = vadd.f32 %v4215_v43, %v3862_v26 }
 0x305   : > { %v4408_v5 = vadd.f32 %v6644_v52, %v4296_v40 }
 0x306   : > { %v3216_v3 = vpop.f32.mrf.mxu2 }
 0x307   : > { %v3296_v9 = vadd.f32 %v3216_v3, %v2863_v39  ;;  %v4444_v12 = vmax.f32 %v4408_v5, 0.0 }
 0x308   : > { %v2786_v7 = vpop.f32.mrf.mxu1 }
 0x309   : > { %v3863_v61 = vadd.f32 %v3783_v15, %v3296_v9  ;;  %v4220_v57 = vpop.f32.mrf.mxu0  ;;  %v2864_v33 = vadd.f32 %v2786_v7, %v6583_v58  ;;  %v5743_v58 = vld [vmem:[%s6966_s2] ss:$0 sm:$0xff] }
 0x30b   : > { %v4297_v13 = vadd.f32 %v4217_v17, %v3863_v61 }
 0x30d   : > { %v4409_v4 = vadd.f32 %v6644_v52, %v4297_v13 }
 0x30e   : > { %v3219_v56 = vpop.f32.mrf.mxu2 }
 0x30f   : > { %v4445_v19 = vmax.f32 %v4409_v4, 0.0  ;;  %v3297_v2 = vadd.f32 %v3219_v56, %v2864_v33 }
 0x310   : > { %v2788_v54 = vpop.f32.mrf.mxu1 }
 0x311   : > { %v5666_v34 = vpack.c.bf16 %v4445_v19, %v4444_v12  ;;  %v3864_v28 = vadd.f32 %v3786_v55, %v3297_v2  ;;  %v2865_v1 = vadd.f32 %v2788_v54, %v6595_v49  ;;  %v4222_v38 = vpop.f32.mrf.mxu0 }
 0x313   : > { %5692 = vst [vmem:[%s6675_s6 + $0x78] sm:$0xff] %v5666_v34   ;;  %v4298_v45 = vadd.f32 %v4220_v57, %v3864_v28 }
 0x315   : > { %v4410_v62 = vadd.f32 %v5743_v58, %v4298_v45 }
 0x316   : > { %v3221_v24 = vpop.f32.mrf.mxu2 }
 0x317   : > { %v3298_v50 = vadd.f32 %v3221_v24, %v2865_v1  ;;  %v4446_v49 = vmax.f32 %v4410_v62, 0.0 }
 0x318   : > { %v2791_v46 = vpop.f32.mrf.mxu1 }
 0x319   : > { %v3865_v52 = vadd.f32 %v3788_v30, %v3298_v50  ;;  %v2866_v32 = vadd.f32 %v2791_v46, %v6607_v22  ;;  %v4225_v25 = vpop.f32.mrf.mxu0  ;;  %v3793_v22 = vpop.f32.mrf.mxu3 }
 0x31b   : > { %v4299_v37 = vadd.f32 %v4222_v38, %v3865_v52 }
 0x31d   : > { %v4411_v16 = vadd.f32 %v5743_v58, %v4299_v37 }
 0x31e   : > { %v3224_v36 = vpop.f32.mrf.mxu2 }
 0x31f   : > { %v4447_v63 = vmax.f32 %v4411_v16, 0.0  ;;  %v3299_v48 = vadd.f32 %v3224_v36, %v2866_v32 }
 0x320   : > { %v2793_v47 = vpop.f32.mrf.mxu1 }
 0x321   : > { %v5671_v42 = vpack.c.bf16 %v4447_v63, %v4446_v49  ;;  %v3866_v53 = vadd.f32 %v3791_v14, %v3299_v48  ;;  %v2867_v21 = vadd.f32 %v2793_v47, %v6619_v41  ;;  %v4227_v35 = vpop.f32.mrf.mxu0 }
 0x323   : > { %5693 = vst [vmem:[%s6675_s6 + $0x80] sm:$0xff] %v5671_v42   ;;  %v4300_v60 = vadd.f32 %v4225_v25, %v3866_v53 }
 0x325   : > { %v4412_v20 = vadd.f32 %v5743_v58, %v4300_v60 }
 0x326   : > { %v3226_v18 = vpop.f32.mrf.mxu2 }
 0x327   : > { %v3300_v23 = vadd.f32 %v3226_v18, %v2867_v21  ;;  %v4448_v41 = vmax.f32 %v4412_v20, 0.0 }
 0x329   : > { %v3867_v27 = vadd.f32 %v3793_v22, %v3300_v23 }
 0x32b   : > { %v4301_v43 = vadd.f32 %v4227_v35, %v3867_v27 }
 0x32d   : > { %v4413_v11 = vadd.f32 %v5743_v58, %v4301_v43 }
 0x32f   : > { %v4449_v8 = vmax.f32 %v4413_v11, 0.0 }
 0x331   : > { %v5676_v51 = vpack.c.bf16 %v4449_v8, %v4448_v41 }
 0x333   : > { %5694 = vst [vmem:[%s6675_s6 + $0x88] sm:$0xff] %v5676_v51  }
 0x334   : > { %5771 = shalt.err (!%p5768_p3)
}
 0x335   : > { %s5808_s4 = smov 64   ;;  %s5809_s5 = smov 4  }
 0x336   : > { %5701 = dma.vmem_to_hbm [thread:$0]  (%p5868_p5), %s4536_s19, 2304, %s4538_s20, %s4523_s16, %s5808_s4, %s5808_s4, %s5809_s5  }
 0x337 PF: > { %p5707_p4 = scmp.ge.s32.totalorder %s5806_s15, 2  ;;  %s4552_s6 = sand.u32 1, %s5794_s12  }
 0x338   : > { %s4553_s7 = scalar_lea.sflag [#allocation4], %s4552_s6 }
 0x339   : > { %p5704_p7 = pnand %p5707_p4, %p5872_p6 }
 0x33b   : > { %p5705_p8 = pneg %p5704_p7 }
 0x33d   : > { %5789 = dma.done.wait (%p5705_p8), %s4553_s7, 2304  }
 0x33e   : > { %5791 = vsyncadd (%p5705_p8), %s4553_s7, 4294964992  ;;  %p13_p9 = scmp.ge.s32.totalorder %s5855_s18, 4   ;;  %s6990_s12 = smov %s5798_s13 }
 0x33f   : > { %s6991_s13 = smov %s5802_s14  ;;  %s6992_s14 = smov %s5866_s21 }
 0x340   : > { %s6993_s15 = smov %s5855_s18  ;;  %15 = sbr.rel (!%p13_p9) target bundleno = 3 (0x3), region = 75 }
 0x345   :  { %4559 = vsyncpa [#allocation4], 1 }
 0x346   :  { %4561 = vsyncpa [#allocation4 + $0x1], 1 }

</bundles_post_ra>
